<compile_context>
chip_gen: v6e
topology: v6e:2x2x1
jax: 0.10.0
libtpu: 0.0.40
codegen_flags: <defaults>
</compile_context>

<pallas_src>
import functools

import jax
import jax.numpy as jnp
from jax.experimental import pallas as pl
from jax.experimental.pallas import tpu as pltpu


def _round_up(x, m):
    return ((x + m - 1) // m) * m


def _default_tile_cols(d):
    # Keep d * tile_cols roughly <= 16K elements so the persistent working set
    # (z, k, s) stays mostly in vregs; never drop below 128 lanes.
    if d <= 16:
        return 1024
    if d <= 32:
        return 512
    if d <= 64:
        return 256
    return 128


def _finish_lanes(z, k, s, o_ref):
    """Given k_i, S_i per element, compute tau and the sparsemax output."""
    support = (1.0 + k * z) > s                              # (D, C)
    k_sup = jnp.sum(support.astype(jnp.float32), axis=0, keepdims=True)
    s_sup = jnp.sum(jnp.where(support, z, 0.0), axis=0, keepdims=True)
    tau = (s_sup - 1.0) / k_sup                              # (1, C), k_sup >= 1
    o_ref[...] = jnp.maximum(z - tau, 0.0).astype(o_ref.dtype)


# ---------------------------------------------------------------------------
# Kernel A1: rows on the lane axis, D small enough to fully unroll.
# x_ref / o_ref: (D, C), C a multiple of 128; columns are independent slices.
# ---------------------------------------------------------------------------
def _sparsemax_lanes_unrolled(x_ref, o_ref, *, d):
    x = x_ref[...].astype(jnp.float32)                       # (D, C)
    z = x - jnp.max(x, axis=0, keepdims=True)                # shift by own max
    k = jnp.zeros_like(z)
    s = jnp.zeros_like(z)
    for j in range(d):                                       # fully unrolled
        zj = z[j:j + 1, :]                                    # (1, C) static slice
        m = (zj >= z).astype(jnp.float32)                     # (D, C)
        k = k + m
        s = s + m * zj
    _finish_lanes(z, k, s, o_ref)


# ---------------------------------------------------------------------------
# Kernel A2: rows on the lane axis, 32 < D <= 128.  fori_loop over j with a
# dynamic sublane read of row j from a VMEM scratch copy of z.
# ---------------------------------------------------------------------------
def _sparsemax_lanes_looped(x_ref, o_ref, z_ref, *, d, unroll):
    x = x_ref[...].astype(jnp.float32)                       # (D, C)
    z = x - jnp.max(x, axis=0, keepdims=True)
    z_ref[...] = z                                           # stash for dynamic row reads

    def body(j, carry):
        k, s = carry
        zj = z_ref[pl.ds(j, 1), :]                           # (1, C) dynamic sublane load
        m = (zj >= z).astype(jnp.float32)                    # (D, C)
        return k + m, s + m * zj

    k, s = jax.lax.fori_loop(
        0, d, body, (jnp.zeros_like(z), jnp.zeros_like(z)), unroll=unroll)
    _finish_lanes(z, k, s, o_ref)


# ---------------------------------------------------------------------------
# Kernel B (fallback, large D): rows on sublanes.  x_ref / o_ref: (R, D).
# Single fused boolean mask; everything else derived from it via jnp.where.
# ---------------------------------------------------------------------------
def _sparsemax_kernel_sublanes(x_ref, o_ref):
    x = x_ref[...].astype(jnp.float32)                       # (R, D)
    z = x - jnp.max(x, axis=-1, keepdims=True)
    zj = z[:, None, :]                                       # (R, 1, D)
    mask = zj >= z[:, :, None]                               # (R, D, D) bool
    k = jnp.sum(mask.astype(jnp.float32), axis=-1)           # (R, D)
    s = jnp.sum(jnp.where(mask, zj, 0.0), axis=-1)           # (R, D)
    support = (1.0 + k * z) > s
    k_sup = jnp.sum(support.astype(jnp.float32), axis=-1, keepdims=True)
    s_sup = jnp.sum(jnp.where(support, z, 0.0), axis=-1, keepdims=True)
    tau = (s_sup - 1.0) / k_sup
    o_ref[...] = jnp.maximum(z - tau, 0.0).astype(o_ref.dtype)


def sparsemax(x, dim=-1, *, tile_cols=None, pairwise_vmem_budget=2 << 20):
    """Sparsemax along `dim`, matching the PyTorch Sparsemax.forward()."""
    ndim = x.ndim
    dim = dim % ndim
    d = x.shape[dim]

    if d <= 128:
        # ---------------- rows-on-lanes path (small D) ----------------
        x_m = jnp.moveaxis(x, dim, 0)                        # (D, ...)
        rest = x_m.shape[1:]
        cols = 1
        for sdim in rest:
            cols *= sdim
        x2 = x_m.reshape(d, cols)

        if tile_cols is None:
            tc = _default_tile_cols(d)
        else:
            tc = _round_up(max(tile_cols, 128), 128)
        tc = min(tc, _round_up(max(cols, 1), 128))

        padded = _round_up(max(cols, 1), tc)
        if padded != cols:
            x2 = jnp.pad(x2, ((0, 0), (0, padded - cols)))

        if d <= 32:
            kernel = functools.partial(_sparsemax_lanes_unrolled, d=d)
            scratch = []
        else:
            kernel = functools.partial(_sparsemax_lanes_looped, d=d,
                                       unroll=min(8, d))
            scratch = [pltpu.VMEM((d, tc), jnp.float32)]

        grid = (padded // tc,)
        out2 = pl.pallas_call(
            kernel,
            out_shape=jax.ShapeDtypeStruct((d, padded), x.dtype),
            grid_spec=pltpu.PrefetchScalarGridSpec(
                num_scalar_prefetch=0,
                grid=grid,
                in_specs=[pl.BlockSpec((d, tc), lambda i: (0, i))],
                out_specs=pl.BlockSpec((d, tc), lambda i: (0, i)),
                scratch_shapes=scratch,
            ),
            compiler_params=pltpu.CompilerParams(
                dimension_semantics=("parallel",)),
        )(x2)

        out = out2[:, :cols].reshape((d,) + rest)
        return jnp.moveaxis(out, 0, dim)

    # ---------------- fallback: rows-on-sublanes path (large D) ----------------
    x_m = jnp.moveaxis(x, dim, ndim - 1)                     # (..., D)
    lead = x_m.shape[:-1]
    rows = 1
    for sdim in lead:
        rows *= sdim
    x2 = x_m.reshape(rows, d)

    # Size the row tile so the fused (R, D, D) mask stays within a small VMEM
    # budget on every generation (v5e/v6e/v7x).
    tr = max(8, min(256, pairwise_vmem_budget // (d * d * 4)))
    tr = (tr // 8) * 8
    padded = _round_up(max(rows, 1), tr)
    if padded != rows:
        x2 = jnp.pad(x2, ((0, padded - rows), (0, 0)))

    grid = (padded // tr,)
    out2 = pl.pallas_call(
        _sparsemax_kernel_sublanes,
        out_shape=jax.ShapeDtypeStruct((padded, d), x.dtype),
        grid_spec=pltpu.PrefetchScalarGridSpec(
            num_scalar_prefetch=0,
            grid=grid,
            in_specs=[pl.BlockSpec((tr, d), lambda i: (i, 0))],
            out_specs=pl.BlockSpec((tr, d), lambda i: (i, 0)),
        ),
        compiler_params=pltpu.CompilerParams(
            dimension_semantics=("parallel",)),
    )(x2)

    out = out2[:rows].reshape(lead + (d,))
    return jnp.moveaxis(out, ndim - 1, dim)


# TODO(synk): the module's custom `backward()` is not part of the forward pass
# and is not implemented here.


def _sparsemax_reference(x, dim=-1):
    """Pure-JAX reference (mirrors the torch code, sort-based)."""
    ndim = x.ndim
    dim = dim % ndim
    x_m = jnp.swapaxes(x, dim, ndim - 1)
    shape = x_m.shape
    z = x_m.reshape(-1, shape[-1])
    z = z - jnp.max(z, axis=1, keepdims=True)
    zs = -jnp.sort(-z, axis=1)  # descending
    d = z.shape[1]
    rng = jnp.arange(1, d + 1, dtype=z.dtype)[None, :]
    bound = 1 + rng * zs
    cs = jnp.cumsum(zs, axis=1)
    is_gt = (bound > cs).astype(z.dtype)
    k = jnp.max(is_gt * rng, axis=1, keepdims=True)
    taus = (jnp.sum(is_gt * zs, axis=1, keepdims=True) - 1) / k
    out = jnp.maximum(jnp.zeros_like(z), z - taus)
    return jnp.swapaxes(out.reshape(shape), dim, ndim - 1)


def _check(name, y, y_ref, sum_axis):
    if not jnp.allclose(y, y_ref, atol=1e-5, rtol=1e-5):
        raise AssertionError(f"{name}: Pallas sparsemax does not match reference")
    if not jnp.allclose(jnp.sum(y, axis=sum_axis), 1.0, atol=1e-5):
        raise AssertionError(f"{name}: sparsemax slices do not sum to 1")


if __name__ == "__main__":
    key = jax.random.PRNGKey(0)

    # TabNet-like logits: (batch=2, seq=8, hidden=32), sparsemax over hidden.
    x = jax.random.normal(key, (2, 8, 32), dtype=jnp.float32)

    y = jax.block_until_ready(sparsemax(x, dim=-1))
    _check("small-D dim=-1", y, _sparsemax_reference(x, dim=-1), sum_axis=-1)

    # Non-last reduction axis (exercises the transpose plumbing, same path).
    y1 = jax.block_until_ready(sparsemax(x, dim=1))
    _check("small-D dim=1", y1, _sparsemax_reference(x, dim=1), sum_axis=1)

    # Mid-D path (32 < D <= 128): fori_loop over rows with VMEM z scratch.
    x_mid = jax.random.normal(jax.random.PRNGKey(2), (4, 96), dtype=jnp.float32)
    y_mid = jax.block_until_ready(sparsemax(x_mid, dim=-1))
    _check("mid-D dim=-1", y_mid, _sparsemax_reference(x_mid, dim=-1), sum_axis=-1)

    # Large-D fallback path (rows-on-sublanes, fused pairwise mask).
    x_big = jax.random.normal(jax.random.PRNGKey(1), (16, 256), dtype=jnp.float32)
    y2 = jax.block_until_ready(sparsemax(x_big, dim=-1))
    _check("large-D dim=-1", y2, _sparsemax_reference(x_big, dim=-1), sum_axis=-1)

    print("KERNEL_OK")
</pallas_src>

<mosaic_0001>
module attributes {stable_mosaic.version = 11 : i64} {
  func.func @_sparsemax_lanes_unrolled(%arg0: i32, %arg1: memref<32x128xf32, #tpu.memory_space<vmem>>, %arg2: memref<32x128xf32, #tpu.memory_space<vmem>>) attributes {dimension_semantics = [#tpu.dimension_semantics<parallel>], iteration_bounds = array<i64: 1>, scalar_prefetch = 0 : i64, scratch_operands = 0 : i64, tpu.core_type = #tpu.core_type<tc>, window_params = [{transform_indices = @transform_0, window_bounds = array<i64: 32, 128>}, {transform_indices = @transform_1, window_bounds = array<i64: 32, 128>}]} {
    %c0 = arith.constant 0 : index
    %c0_0 = arith.constant 0 : index
    %0 = vector.load %arg1[%c0, %c0_0] : memref<32x128xf32, #tpu.memory_space<vmem>>, vector<32x128xf32>
    %cst = arith.constant dense<0xFF800000> : vector<128xf32>
    %1 = vector.multi_reduction <maximumf>, %0, %cst [0] : vector<32x128xf32> to vector<128xf32>
    %2 = vector.shape_cast %1 : vector<128xf32> to vector<1x128xf32>
    %3 = vector.broadcast %2 : vector<1x128xf32> to vector<32x128xf32>
    %4 = arith.subf %0, %3 : vector<32x128xf32>
    %cst_1 = arith.constant 0.000000e+00 : f32
    %5 = vector.broadcast %cst_1 : f32 to vector<32x128xf32>
    %cst_2 = arith.constant 0.000000e+00 : f32
    %6 = vector.broadcast %cst_2 : f32 to vector<32x128xf32>
    %7 = vector.extract_strided_slice %4 {offsets = [0, 0], sizes = [1, 128], strides = [1, 1]} : vector<32x128xf32> to vector<1x128xf32>
    %8 = vector.broadcast %7 : vector<1x128xf32> to vector<32x128xf32>
    %9 = arith.cmpf oge, %8, %4 : vector<32x128xf32>
    %10 = arith.extui %9 : vector<32x128xi1> to vector<32x128xi32>
    %11 = arith.sitofp %10 : vector<32x128xi32> to vector<32x128xf32>
    %12 = arith.addf %5, %11 : vector<32x128xf32>
    %13 = vector.broadcast %7 : vector<1x128xf32> to vector<32x128xf32>
    %14 = arith.mulf %11, %13 : vector<32x128xf32>
    %15 = arith.addf %6, %14 : vector<32x128xf32>
    %16 = vector.extract_strided_slice %4 {offsets = [1, 0], sizes = [1, 128], strides = [1, 1]} : vector<32x128xf32> to vector<1x128xf32>
    %17 = vector.broadcast %16 : vector<1x128xf32> to vector<32x128xf32>
    %18 = arith.cmpf oge, %17, %4 : vector<32x128xf32>
    %19 = arith.extui %18 : vector<32x128xi1> to vector<32x128xi32>
    %20 = arith.sitofp %19 : vector<32x128xi32> to vector<32x128xf32>
    %21 = arith.addf %12, %20 : vector<32x128xf32>
    %22 = vector.broadcast %16 : vector<1x128xf32> to vector<32x128xf32>
    %23 = arith.mulf %20, %22 : vector<32x128xf32>
    %24 = arith.addf %15, %23 : vector<32x128xf32>
    %25 = vector.extract_strided_slice %4 {offsets = [2, 0], sizes = [1, 128], strides = [1, 1]} : vector<32x128xf32> to vector<1x128xf32>
    %26 = vector.broadcast %25 : vector<1x128xf32> to vector<32x128xf32>
    %27 = arith.cmpf oge, %26, %4 : vector<32x128xf32>
    %28 = arith.extui %27 : vector<32x128xi1> to vector<32x128xi32>
    %29 = arith.sitofp %28 : vector<32x128xi32> to vector<32x128xf32>
    %30 = arith.addf %21, %29 : vector<32x128xf32>
    %31 = vector.broadcast %25 : vector<1x128xf32> to vector<32x128xf32>
    %32 = arith.mulf %29, %31 : vector<32x128xf32>
    %33 = arith.addf %24, %32 : vector<32x128xf32>
    %34 = vector.extract_strided_slice %4 {offsets = [3, 0], sizes = [1, 128], strides = [1, 1]} : vector<32x128xf32> to vector<1x128xf32>
    %35 = vector.broadcast %34 : vector<1x128xf32> to vector<32x128xf32>
    %36 = arith.cmpf oge, %35, %4 : vector<32x128xf32>
    %37 = arith.extui %36 : vector<32x128xi1> to vector<32x128xi32>
    %38 = arith.sitofp %37 : vector<32x128xi32> to vector<32x128xf32>
    %39 = arith.addf %30, %38 : vector<32x128xf32>
    %40 = vector.broadcast %34 : vector<1x128xf32> to vector<32x128xf32>
    %41 = arith.mulf %38, %40 : vector<32x128xf32>
    %42 = arith.addf %33, %41 : vector<32x128xf32>
    %43 = vector.extract_strided_slice %4 {offsets = [4, 0], sizes = [1, 128], strides = [1, 1]} : vector<32x128xf32> to vector<1x128xf32>
    %44 = vector.broadcast %43 : vector<1x128xf32> to vector<32x128xf32>
    %45 = arith.cmpf oge, %44, %4 : vector<32x128xf32>
    %46 = arith.extui %45 : vector<32x128xi1> to vector<32x128xi32>
    %47 = arith.sitofp %46 : vector<32x128xi32> to vector<32x128xf32>
    %48 = arith.addf %39, %47 : vector<32x128xf32>
    %49 = vector.broadcast %43 : vector<1x128xf32> to vector<32x128xf32>
    %50 = arith.mulf %47, %49 : vector<32x128xf32>
    %51 = arith.addf %42, %50 : vector<32x128xf32>
    %52 = vector.extract_strided_slice %4 {offsets = [5, 0], sizes = [1, 128], strides = [1, 1]} : vector<32x128xf32> to vector<1x128xf32>
    %53 = vector.broadcast %52 : vector<1x128xf32> to vector<32x128xf32>
    %54 = arith.cmpf oge, %53, %4 : vector<32x128xf32>
    %55 = arith.extui %54 : vector<32x128xi1> to vector<32x128xi32>
    %56 = arith.sitofp %55 : vector<32x128xi32> to vector<32x128xf32>
    %57 = arith.addf %48, %56 : vector<32x128xf32>
    %58 = vector.broadcast %52 : vector<1x128xf32> to vector<32x128xf32>
    %59 = arith.mulf %56, %58 : vector<32x128xf32>
    %60 = arith.addf %51, %59 : vector<32x128xf32>
    %61 = vector.extract_strided_slice %4 {offsets = [6, 0], sizes = [1, 128], strides = [1, 1]} : vector<32x128xf32> to vector<1x128xf32>
    %62 = vector.broadcast %61 : vector<1x128xf32> to vector<32x128xf32>
    %63 = arith.cmpf oge, %62, %4 : vector<32x128xf32>
    %64 = arith.extui %63 : vector<32x128xi1> to vector<32x128xi32>
    %65 = arith.sitofp %64 : vector<32x128xi32> to vector<32x128xf32>
    %66 = arith.addf %57, %65 : vector<32x128xf32>
    %67 = vector.broadcast %61 : vector<1x128xf32> to vector<32x128xf32>
    %68 = arith.mulf %65, %67 : vector<32x128xf32>
    %69 = arith.addf %60, %68 : vector<32x128xf32>
    %70 = vector.extract_strided_slice %4 {offsets = [7, 0], sizes = [1, 128], strides = [1, 1]} : vector<32x128xf32> to vector<1x128xf32>
    %71 = vector.broadcast %70 : vector<1x128xf32> to vector<32x128xf32>
    %72 = arith.cmpf oge, %71, %4 : vector<32x128xf32>
    %73 = arith.extui %72 : vector<32x128xi1> to vector<32x128xi32>
    %74 = arith.sitofp %73 : vector<32x128xi32> to vector<32x128xf32>
    %75 = arith.addf %66, %74 : vector<32x128xf32>
    %76 = vector.broadcast %70 : vector<1x128xf32> to vector<32x128xf32>
    %77 = arith.mulf %74, %76 : vector<32x128xf32>
    %78 = arith.addf %69, %77 : vector<32x128xf32>
    %79 = vector.extract_strided_slice %4 {offsets = [8, 0], sizes = [1, 128], strides = [1, 1]} : vector<32x128xf32> to vector<1x128xf32>
    %80 = vector.broadcast %79 : vector<1x128xf32> to vector<32x128xf32>
    %81 = arith.cmpf oge, %80, %4 : vector<32x128xf32>
    %82 = arith.extui %81 : vector<32x128xi1> to vector<32x128xi32>
    %83 = arith.sitofp %82 : vector<32x128xi32> to vector<32x128xf32>
    %84 = arith.addf %75, %83 : vector<32x128xf32>
    %85 = vector.broadcast %79 : vector<1x128xf32> to vector<32x128xf32>
    %86 = arith.mulf %83, %85 : vector<32x128xf32>
    %87 = arith.addf %78, %86 : vector<32x128xf32>
    %88 = vector.extract_strided_slice %4 {offsets = [9, 0], sizes = [1, 128], strides = [1, 1]} : vector<32x128xf32> to vector<1x128xf32>
    %89 = vector.broadcast %88 : vector<1x128xf32> to vector<32x128xf32>
    %90 = arith.cmpf oge, %89, %4 : vector<32x128xf32>
    %91 = arith.extui %90 : vector<32x128xi1> to vector<32x128xi32>
    %92 = arith.sitofp %91 : vector<32x128xi32> to vector<32x128xf32>
    %93 = arith.addf %84, %92 : vector<32x128xf32>
    %94 = vector.broadcast %88 : vector<1x128xf32> to vector<32x128xf32>
    %95 = arith.mulf %92, %94 : vector<32x128xf32>
    %96 = arith.addf %87, %95 : vector<32x128xf32>
    %97 = vector.extract_strided_slice %4 {offsets = [10, 0], sizes = [1, 128], strides = [1, 1]} : vector<32x128xf32> to vector<1x128xf32>
    %98 = vector.broadcast %97 : vector<1x128xf32> to vector<32x128xf32>
    %99 = arith.cmpf oge, %98, %4 : vector<32x128xf32>
    %100 = arith.extui %99 : vector<32x128xi1> to vector<32x128xi32>
    %101 = arith.sitofp %100 : vector<32x128xi32> to vector<32x128xf32>
    %102 = arith.addf %93, %101 : vector<32x128xf32>
    %103 = vector.broadcast %97 : vector<1x128xf32> to vector<32x128xf32>
    %104 = arith.mulf %101, %103 : vector<32x128xf32>
    %105 = arith.addf %96, %104 : vector<32x128xf32>
    %106 = vector.extract_strided_slice %4 {offsets = [11, 0], sizes = [1, 128], strides = [1, 1]} : vector<32x128xf32> to vector<1x128xf32>
    %107 = vector.broadcast %106 : vector<1x128xf32> to vector<32x128xf32>
    %108 = arith.cmpf oge, %107, %4 : vector<32x128xf32>
    %109 = arith.extui %108 : vector<32x128xi1> to vector<32x128xi32>
    %110 = arith.sitofp %109 : vector<32x128xi32> to vector<32x128xf32>
    %111 = arith.addf %102, %110 : vector<32x128xf32>
    %112 = vector.broadcast %106 : vector<1x128xf32> to vector<32x128xf32>
    %113 = arith.mulf %110, %112 : vector<32x128xf32>
    %114 = arith.addf %105, %113 : vector<32x128xf32>
    %115 = vector.extract_strided_slice %4 {offsets = [12, 0], sizes = [1, 128], strides = [1, 1]} : vector<32x128xf32> to vector<1x128xf32>
    %116 = vector.broadcast %115 : vector<1x128xf32> to vector<32x128xf32>
    %117 = arith.cmpf oge, %116, %4 : vector<32x128xf32>
    %118 = arith.extui %117 : vector<32x128xi1> to vector<32x128xi32>
    %119 = arith.sitofp %118 : vector<32x128xi32> to vector<32x128xf32>
    %120 = arith.addf %111, %119 : vector<32x128xf32>
    %121 = vector.broadcast %115 : vector<1x128xf32> to vector<32x128xf32>
    %122 = arith.mulf %119, %121 : vector<32x128xf32>
    %123 = arith.addf %114, %122 : vector<32x128xf32>
    %124 = vector.extract_strided_slice %4 {offsets = [13, 0], sizes = [1, 128], strides = [1, 1]} : vector<32x128xf32> to vector<1x128xf32>
    %125 = vector.broadcast %124 : vector<1x128xf32> to vector<32x128xf32>
    %126 = arith.cmpf oge, %125, %4 : vector<32x128xf32>
    %127 = arith.extui %126 : vector<32x128xi1> to vector<32x128xi32>
    %128 = arith.sitofp %127 : vector<32x128xi32> to vector<32x128xf32>
    %129 = arith.addf %120, %128 : vector<32x128xf32>
    %130 = vector.broadcast %124 : vector<1x128xf32> to vector<32x128xf32>
    %131 = arith.mulf %128, %130 : vector<32x128xf32>
    %132 = arith.addf %123, %131 : vector<32x128xf32>
    %133 = vector.extract_strided_slice %4 {offsets = [14, 0], sizes = [1, 128], strides = [1, 1]} : vector<32x128xf32> to vector<1x128xf32>
    %134 = vector.broadcast %133 : vector<1x128xf32> to vector<32x128xf32>
    %135 = arith.cmpf oge, %134, %4 : vector<32x128xf32>
    %136 = arith.extui %135 : vector<32x128xi1> to vector<32x128xi32>
    %137 = arith.sitofp %136 : vector<32x128xi32> to vector<32x128xf32>
    %138 = arith.addf %129, %137 : vector<32x128xf32>
    %139 = vector.broadcast %133 : vector<1x128xf32> to vector<32x128xf32>
    %140 = arith.mulf %137, %139 : vector<32x128xf32>
    %141 = arith.addf %132, %140 : vector<32x128xf32>
    %142 = vector.extract_strided_slice %4 {offsets = [15, 0], sizes = [1, 128], strides = [1, 1]} : vector<32x128xf32> to vector<1x128xf32>
    %143 = vector.broadcast %142 : vector<1x128xf32> to vector<32x128xf32>
    %144 = arith.cmpf oge, %143, %4 : vector<32x128xf32>
    %145 = arith.extui %144 : vector<32x128xi1> to vector<32x128xi32>
    %146 = arith.sitofp %145 : vector<32x128xi32> to vector<32x128xf32>
    %147 = arith.addf %138, %146 : vector<32x128xf32>
    %148 = vector.broadcast %142 : vector<1x128xf32> to vector<32x128xf32>
    %149 = arith.mulf %146, %148 : vector<32x128xf32>
    %150 = arith.addf %141, %149 : vector<32x128xf32>
    %151 = vector.extract_strided_slice %4 {offsets = [16, 0], sizes = [1, 128], strides = [1, 1]} : vector<32x128xf32> to vector<1x128xf32>
    %152 = vector.broadcast %151 : vector<1x128xf32> to vector<32x128xf32>
    %153 = arith.cmpf oge, %152, %4 : vector<32x128xf32>
    %154 = arith.extui %153 : vector<32x128xi1> to vector<32x128xi32>
    %155 = arith.sitofp %154 : vector<32x128xi32> to vector<32x128xf32>
    %156 = arith.addf %147, %155 : vector<32x128xf32>
    %157 = vector.broadcast %151 : vector<1x128xf32> to vector<32x128xf32>
    %158 = arith.mulf %155, %157 : vector<32x128xf32>
    %159 = arith.addf %150, %158 : vector<32x128xf32>
    %160 = vector.extract_strided_slice %4 {offsets = [17, 0], sizes = [1, 128], strides = [1, 1]} : vector<32x128xf32> to vector<1x128xf32>
    %161 = vector.broadcast %160 : vector<1x128xf32> to vector<32x128xf32>
    %162 = arith.cmpf oge, %161, %4 : vector<32x128xf32>
    %163 = arith.extui %162 : vector<32x128xi1> to vector<32x128xi32>
    %164 = arith.sitofp %163 : vector<32x128xi32> to vector<32x128xf32>
    %165 = arith.addf %156, %164 : vector<32x128xf32>
    %166 = vector.broadcast %160 : vector<1x128xf32> to vector<32x128xf32>
    %167 = arith.mulf %164, %166 : vector<32x128xf32>
    %168 = arith.addf %159, %167 : vector<32x128xf32>
    %169 = vector.extract_strided_slice %4 {offsets = [18, 0], sizes = [1, 128], strides = [1, 1]} : vector<32x128xf32> to vector<1x128xf32>
    %170 = vector.broadcast %169 : vector<1x128xf32> to vector<32x128xf32>
    %171 = arith.cmpf oge, %170, %4 : vector<32x128xf32>
    %172 = arith.extui %171 : vector<32x128xi1> to vector<32x128xi32>
    %173 = arith.sitofp %172 : vector<32x128xi32> to vector<32x128xf32>
    %174 = arith.addf %165, %173 : vector<32x128xf32>
    %175 = vector.broadcast %169 : vector<1x128xf32> to vector<32x128xf32>
    %176 = arith.mulf %173, %175 : vector<32x128xf32>
    %177 = arith.addf %168, %176 : vector<32x128xf32>
    %178 = vector.extract_strided_slice %4 {offsets = [19, 0], sizes = [1, 128], strides = [1, 1]} : vector<32x128xf32> to vector<1x128xf32>
    %179 = vector.broadcast %178 : vector<1x128xf32> to vector<32x128xf32>
    %180 = arith.cmpf oge, %179, %4 : vector<32x128xf32>
    %181 = arith.extui %180 : vector<32x128xi1> to vector<32x128xi32>
    %182 = arith.sitofp %181 : vector<32x128xi32> to vector<32x128xf32>
    %183 = arith.addf %174, %182 : vector<32x128xf32>
    %184 = vector.broadcast %178 : vector<1x128xf32> to vector<32x128xf32>
    %185 = arith.mulf %182, %184 : vector<32x128xf32>
    %186 = arith.addf %177, %185 : vector<32x128xf32>
    %187 = vector.extract_strided_slice %4 {offsets = [20, 0], sizes = [1, 128], strides = [1, 1]} : vector<32x128xf32> to vector<1x128xf32>
    %188 = vector.broadcast %187 : vector<1x128xf32> to vector<32x128xf32>
    %189 = arith.cmpf oge, %188, %4 : vector<32x128xf32>
    %190 = arith.extui %189 : vector<32x128xi1> to vector<32x128xi32>
    %191 = arith.sitofp %190 : vector<32x128xi32> to vector<32x128xf32>
    %192 = arith.addf %183, %191 : vector<32x128xf32>
    %193 = vector.broadcast %187 : vector<1x128xf32> to vector<32x128xf32>
    %194 = arith.mulf %191, %193 : vector<32x128xf32>
    %195 = arith.addf %186, %194 : vector<32x128xf32>
    %196 = vector.extract_strided_slice %4 {offsets = [21, 0], sizes = [1, 128], strides = [1, 1]} : vector<32x128xf32> to vector<1x128xf32>
    %197 = vector.broadcast %196 : vector<1x128xf32> to vector<32x128xf32>
    %198 = arith.cmpf oge, %197, %4 : vector<32x128xf32>
    %199 = arith.extui %198 : vector<32x128xi1> to vector<32x128xi32>
    %200 = arith.sitofp %199 : vector<32x128xi32> to vector<32x128xf32>
    %201 = arith.addf %192, %200 : vector<32x128xf32>
    %202 = vector.broadcast %196 : vector<1x128xf32> to vector<32x128xf32>
    %203 = arith.mulf %200, %202 : vector<32x128xf32>
    %204 = arith.addf %195, %203 : vector<32x128xf32>
    %205 = vector.extract_strided_slice %4 {offsets = [22, 0], sizes = [1, 128], strides = [1, 1]} : vector<32x128xf32> to vector<1x128xf32>
    %206 = vector.broadcast %205 : vector<1x128xf32> to vector<32x128xf32>
    %207 = arith.cmpf oge, %206, %4 : vector<32x128xf32>
    %208 = arith.extui %207 : vector<32x128xi1> to vector<32x128xi32>
    %209 = arith.sitofp %208 : vector<32x128xi32> to vector<32x128xf32>
    %210 = arith.addf %201, %209 : vector<32x128xf32>
    %211 = vector.broadcast %205 : vector<1x128xf32> to vector<32x128xf32>
    %212 = arith.mulf %209, %211 : vector<32x128xf32>
    %213 = arith.addf %204, %212 : vector<32x128xf32>
    %214 = vector.extract_strided_slice %4 {offsets = [23, 0], sizes = [1, 128], strides = [1, 1]} : vector<32x128xf32> to vector<1x128xf32>
    %215 = vector.broadcast %214 : vector<1x128xf32> to vector<32x128xf32>
    %216 = arith.cmpf oge, %215, %4 : vector<32x128xf32>
    %217 = arith.extui %216 : vector<32x128xi1> to vector<32x128xi32>
    %218 = arith.sitofp %217 : vector<32x128xi32> to vector<32x128xf32>
    %219 = arith.addf %210, %218 : vector<32x128xf32>
    %220 = vector.broadcast %214 : vector<1x128xf32> to vector<32x128xf32>
    %221 = arith.mulf %218, %220 : vector<32x128xf32>
    %222 = arith.addf %213, %221 : vector<32x128xf32>
    %223 = vector.extract_strided_slice %4 {offsets = [24, 0], sizes = [1, 128], strides = [1, 1]} : vector<32x128xf32> to vector<1x128xf32>
    %224 = vector.broadcast %223 : vector<1x128xf32> to vector<32x128xf32>
    %225 = arith.cmpf oge, %224, %4 : vector<32x128xf32>
    %226 = arith.extui %225 : vector<32x128xi1> to vector<32x128xi32>
    %227 = arith.sitofp %226 : vector<32x128xi32> to vector<32x128xf32>
    %228 = arith.addf %219, %227 : vector<32x128xf32>
    %229 = vector.broadcast %223 : vector<1x128xf32> to vector<32x128xf32>
    %230 = arith.mulf %227, %229 : vector<32x128xf32>
    %231 = arith.addf %222, %230 : vector<32x128xf32>
    %232 = vector.extract_strided_slice %4 {offsets = [25, 0], sizes = [1, 128], strides = [1, 1]} : vector<32x128xf32> to vector<1x128xf32>
    %233 = vector.broadcast %232 : vector<1x128xf32> to vector<32x128xf32>
    %234 = arith.cmpf oge, %233, %4 : vector<32x128xf32>
    %235 = arith.extui %234 : vector<32x128xi1> to vector<32x128xi32>
    %236 = arith.sitofp %235 : vector<32x128xi32> to vector<32x128xf32>
    %237 = arith.addf %228, %236 : vector<32x128xf32>
    %238 = vector.broadcast %232 : vector<1x128xf32> to vector<32x128xf32>
    %239 = arith.mulf %236, %238 : vector<32x128xf32>
    %240 = arith.addf %231, %239 : vector<32x128xf32>
    %241 = vector.extract_strided_slice %4 {offsets = [26, 0], sizes = [1, 128], strides = [1, 1]} : vector<32x128xf32> to vector<1x128xf32>
    %242 = vector.broadcast %241 : vector<1x128xf32> to vector<32x128xf32>
    %243 = arith.cmpf oge, %242, %4 : vector<32x128xf32>
    %244 = arith.extui %243 : vector<32x128xi1> to vector<32x128xi32>
    %245 = arith.sitofp %244 : vector<32x128xi32> to vector<32x128xf32>
    %246 = arith.addf %237, %245 : vector<32x128xf32>
    %247 = vector.broadcast %241 : vector<1x128xf32> to vector<32x128xf32>
    %248 = arith.mulf %245, %247 : vector<32x128xf32>
    %249 = arith.addf %240, %248 : vector<32x128xf32>
    %250 = vector.extract_strided_slice %4 {offsets = [27, 0], sizes = [1, 128], strides = [1, 1]} : vector<32x128xf32> to vector<1x128xf32>
    %251 = vector.broadcast %250 : vector<1x128xf32> to vector<32x128xf32>
    %252 = arith.cmpf oge, %251, %4 : vector<32x128xf32>
    %253 = arith.extui %252 : vector<32x128xi1> to vector<32x128xi32>
    %254 = arith.sitofp %253 : vector<32x128xi32> to vector<32x128xf32>
    %255 = arith.addf %246, %254 : vector<32x128xf32>
    %256 = vector.broadcast %250 : vector<1x128xf32> to vector<32x128xf32>
    %257 = arith.mulf %254, %256 : vector<32x128xf32>
    %258 = arith.addf %249, %257 : vector<32x128xf32>
    %259 = vector.extract_strided_slice %4 {offsets = [28, 0], sizes = [1, 128], strides = [1, 1]} : vector<32x128xf32> to vector<1x128xf32>
    %260 = vector.broadcast %259 : vector<1x128xf32> to vector<32x128xf32>
    %261 = arith.cmpf oge, %260, %4 : vector<32x128xf32>
    %262 = arith.extui %261 : vector<32x128xi1> to vector<32x128xi32>
    %263 = arith.sitofp %262 : vector<32x128xi32> to vector<32x128xf32>
    %264 = arith.addf %255, %263 : vector<32x128xf32>
    %265 = vector.broadcast %259 : vector<1x128xf32> to vector<32x128xf32>
    %266 = arith.mulf %263, %265 : vector<32x128xf32>
    %267 = arith.addf %258, %266 : vector<32x128xf32>
    %268 = vector.extract_strided_slice %4 {offsets = [29, 0], sizes = [1, 128], strides = [1, 1]} : vector<32x128xf32> to vector<1x128xf32>
    %269 = vector.broadcast %268 : vector<1x128xf32> to vector<32x128xf32>
    %270 = arith.cmpf oge, %269, %4 : vector<32x128xf32>
    %271 = arith.extui %270 : vector<32x128xi1> to vector<32x128xi32>
    %272 = arith.sitofp %271 : vector<32x128xi32> to vector<32x128xf32>
    %273 = arith.addf %264, %272 : vector<32x128xf32>
    %274 = vector.broadcast %268 : vector<1x128xf32> to vector<32x128xf32>
    %275 = arith.mulf %272, %274 : vector<32x128xf32>
    %276 = arith.addf %267, %275 : vector<32x128xf32>
    %277 = vector.extract_strided_slice %4 {offsets = [30, 0], sizes = [1, 128], strides = [1, 1]} : vector<32x128xf32> to vector<1x128xf32>
    %278 = vector.broadcast %277 : vector<1x128xf32> to vector<32x128xf32>
    %279 = arith.cmpf oge, %278, %4 : vector<32x128xf32>
    %280 = arith.extui %279 : vector<32x128xi1> to vector<32x128xi32>
    %281 = arith.sitofp %280 : vector<32x128xi32> to vector<32x128xf32>
    %282 = arith.addf %273, %281 : vector<32x128xf32>
    %283 = vector.broadcast %277 : vector<1x128xf32> to vector<32x128xf32>
    %284 = arith.mulf %281, %283 : vector<32x128xf32>
    %285 = arith.addf %276, %284 : vector<32x128xf32>
    %286 = vector.extract_strided_slice %4 {offsets = [31, 0], sizes = [1, 128], strides = [1, 1]} : vector<32x128xf32> to vector<1x128xf32>
    %287 = vector.broadcast %286 : vector<1x128xf32> to vector<32x128xf32>
    %288 = arith.cmpf oge, %287, %4 : vector<32x128xf32>
    %289 = arith.extui %288 : vector<32x128xi1> to vector<32x128xi32>
    %290 = arith.sitofp %289 : vector<32x128xi32> to vector<32x128xf32>
    %291 = arith.addf %282, %290 : vector<32x128xf32>
    %292 = vector.broadcast %286 : vector<1x128xf32> to vector<32x128xf32>
    %293 = arith.mulf %290, %292 : vector<32x128xf32>
    %294 = arith.addf %285, %293 : vector<32x128xf32>
    %295 = arith.mulf %291, %4 : vector<32x128xf32>
    %cst_3 = arith.constant 1.000000e+00 : f32
    %296 = vector.broadcast %cst_3 : f32 to vector<32x128xf32>
    %297 = arith.addf %296, %295 : vector<32x128xf32>
    %298 = arith.cmpf ogt, %297, %294 : vector<32x128xf32>
    %299 = arith.extui %298 : vector<32x128xi1> to vector<32x128xi32>
    %300 = arith.sitofp %299 : vector<32x128xi32> to vector<32x128xf32>
    %cst_4 = arith.constant dense<0.000000e+00> : vector<128xf32>
    %301 = vector.multi_reduction <add>, %300, %cst_4 [0] : vector<32x128xf32> to vector<128xf32>
    %302 = vector.shape_cast %301 : vector<128xf32> to vector<1x128xf32>
    %cst_5 = arith.constant 0.000000e+00 : f32
    %303 = vector.broadcast %cst_5 : f32 to vector<32x128xf32>
    %304 = arith.select %298, %4, %303 : vector<32x128xi1>, vector<32x128xf32>
    %cst_6 = arith.constant dense<0.000000e+00> : vector<128xf32>
    %305 = vector.multi_reduction <add>, %304, %cst_6 [0] : vector<32x128xf32> to vector<128xf32>
    %306 = vector.shape_cast %305 : vector<128xf32> to vector<1x128xf32>
    %cst_7 = arith.constant 1.000000e+00 : f32
    %307 = vector.broadcast %cst_7 : f32 to vector<1x128xf32>
    %308 = arith.subf %306, %307 : vector<1x128xf32>
    %309 = arith.divf %308, %302 : vector<1x128xf32>
    %310 = vector.broadcast %309 : vector<1x128xf32> to vector<32x128xf32>
    %311 = arith.subf %4, %310 : vector<32x128xf32>
    %cst_8 = arith.constant 0.000000e+00 : f32
    %312 = vector.broadcast %cst_8 : f32 to vector<32x128xf32>
    %313 = arith.maximumf %311, %312 : vector<32x128xf32>
    %c0_9 = arith.constant 0 : index
    %c0_10 = arith.constant 0 : index
    %314 = vector.load %arg2[%c0_9, %c0_10] : memref<32x128xf32, #tpu.memory_space<vmem>>, vector<32x128xf32>
    tpu.vector_store %arg2[%c0_9, %c0_10], %313 {strides = array<i32>} : memref<32x128xf32, #tpu.memory_space<vmem>>, vector<32x128xf32>,
    return
  }
  func.func @transform_0(%arg0: i32) -> (i32, i32) {
    %c0_i32 = arith.constant 0 : i32
    %c0_i32_0 = arith.constant 0 : i32
    return %c0_i32, %arg0 : i32, i32
  }
  func.func @transform_1(%arg0: i32) -> (i32, i32) {
    %c0_i32 = arith.constant 0 : i32
    %c0_i32_0 = arith.constant 0 : i32
    return %c0_i32, %arg0 : i32, i32
  }
}

</mosaic_0001>

<bundles_post_ra>
// kernel: tpu_custom_call.1
= control target key start
LH: loop header
LB: loop body
LE: loop exit
PB: predicated region body
PF: predicated region fallthrough
CT: control target
= control target key end

     0   :  { %6 = vsyncpa [#allocation3], 0  ;;  %s1691_s0 = inlined_call_operand.hbm [shape: f32[32,128], index: 0, kind: input, shape index: {}]   ;;  %s1692_s1 = inlined_call_operand.hbm [shape: f32[32,128], index: 1, kind: output, shape index: {}]  }
   0x1   :  { %7 = vsyncpa [#allocation4], 0  ;;  %s1194_s6 = smov [#allocation2]  }
   0x2   :  { %s13_s7 = sshll.u32 %s1194_s6, 4  ;;  %s14_s7 = int_to_ptr.vmem [resolvable:$true] %s13_s7 }
   0x3   :  { %s1158_s8 = scalar_lea.vmem %s14_s7, 512  ;;  %p1163_p1 = scmp.lt.s32.totalorder %s14_s7, %s14_s7 }
   0x4   :  { %p1159_p0 = scmp.ne.s32.totalorder %s14_s7, %s1158_s8  ;;  %p1164_p2 = scmp.lt.s32.totalorder %s1158_s8, %s1158_s8 }
   0x6   :  { %p1165_p3 = por %p1164_p2, %p1163_p1 }
   0x8   :  { %p1166_p4 = pnand %p1165_p3, %p1159_p0 }
   0xa   :  { %1169 = shalt.err (!%p1166_p4)
}
   0xb   :  { %s1195_s9 = smov 128   ;;  %s1196_s10 = smov 8  }
   0xc   :  { %19 = dma.hbm_to_vmem [thread:$0]  %s1691_s0, 512, %s14_s7, [#allocation3], %s1195_s9, %s1195_s9, %s1196_s10  }
   0xd   :  { %1190 = dma.done.wait [#allocation3], 512  }
   0xe   :  { %1191 = vsyncadd [#allocation3], 4294966784  ;;  %v23_v0 = vld [vmem:[#allocation2] sm:$0xff]  ;;  %v24_v1 = vld [vmem:[#allocation2 + $0x8] sm:$0xff]  ;;  %v40_v8 = vlaneseq  ;;  %v1197_v35 = vmov 0.0   ;;  %s1198_s0 = smov [#allocation5]  }
   0xf   :  { %v25_v2 = vld [vmem:[#allocation2 + $0x10] sm:$0xff]  ;;  %v26_v3 = vld [vmem:[#allocation2 + $0x18] sm:$0xff]  ;;  %v27_v4 = vmax.f32 %v23_v0, %v24_v1  ;;  %s998_s13 = sshll.u32 %s1198_s0, 4  ;;  %s999_s13 = int_to_ptr.vmem [resolvable:$true] %s998_s13 }
  0x10   :  { %v28_v5 = vmax.f32 %v25_v2, %v26_v3  ;;  %v41_v11 = vshrl.u32 %v40_v8, 7  ;;  %s1170_s14 = scalar_lea.vmem %s999_s13, 512  ;;  %p1175_p6 = scmp.lt.s32.totalorder %s999_s13, %s999_s13 }
  0x11   :  { %p1171_p5 = scmp.ne.s32.totalorder %s999_s13, %s1170_s14  ;;  %p1176_p7 = scmp.lt.s32.totalorder %s1170_s14, %s1170_s14 }
  0x12   :  { %v29_v6 = vmax.f32 %v27_v4, %v28_v5  ;;  %v1215_v14 = vsub.s32 0, %v41_v11  ;;  %v1217_v16 = vsub.s32 1, %v41_v11  ;;  %v1219_v17 = vsub.s32 2, %v41_v11 }
  0x13   :  { %v1221_v18 = vsub.s32 3, %v41_v11  ;;  %v1223_v19 = vsub.s32 4, %v41_v11  ;;  %v1225_v20 = vsub.s32 5, %v41_v11  ;;  %v1227_v21 = vsub.s32 6, %v41_v11  ;;  %p1177_p8 = por %p1176_p7, %p1175_p6 }
  0x14   :  { %v30_v7 = vrot.slane %v29_v6, 4  ;;  %v1229_v22 = vsub.s32 7, %v41_v11 }
  0x15   :  { %p1178_p9 = pnand %p1177_p8, %p1171_p5 }
  0x16   :  { %v31_v9 = vmax.f32 %v29_v6, %v30_v7 }
  0x18   :  { %v32_v10 = vrot.slane %v31_v9, 2 }
  0x1a   :  { %v33_v12 = vmax.f32 %v31_v9, %v32_v10 }
  0x1c   :  { %v34_v13 = vrot.slane %v33_v12, 1 }
  0x1e   :  { %v35_v15 = vmax.f32 %v33_v12, %v34_v13 }
  0x20   :  { %v1231_v23 = vsub.f32 %v23_v0, %v35_v15  ;;  %v1233_v24 = vsub.f32 %v24_v1, %v35_v15  ;;  %v1235_v25 = vsub.f32 %v25_v2, %v35_v15  ;;  %v1237_v26 = vsub.f32 %v26_v3, %v35_v15 }
  0x22   :  { %v43_v27 = vrot.slane %v1231_v23, %v1215_v14  ;;  %v71_v28 = vrot.slane %v1231_v23, %v1217_v16  ;;  %v99_v29 = vrot.slane %v1231_v23, %v1219_v17  ;;  %v1247_v30 = vrot.slane %v1231_v23, %v1221_v18 }
  0x23   :  { %v1251_v31 = vrot.slane %v1231_v23, %v1223_v19  ;;  %v1255_v32 = vrot.slane %v1231_v23, %v1225_v20  ;;  %v1259_v33 = vrot.slane %v1231_v23, %v1227_v21  ;;  %v1263_v34 = vrot.slane %v1231_v23, %v1229_v22 }
  0x24   :  { %vm44_vm0 = vcmp.ge.f32.partialorder %v43_v27, %v1231_v23  ;;  %vm45_vm1 = vcmp.ge.f32.partialorder %v43_v27, %v1233_v24  ;;  %vm46_vm2 = vcmp.ge.f32.partialorder %v43_v27, %v1235_v25  ;;  %vm47_vm3 = vcmp.ge.f32.partialorder %v43_v27, %v1237_v26 }
  0x25   :  { %v1010_v36 = vsel %vm44_vm0, 1.0, %v1197_v35  ;;  %v1011_v37 = vsel %vm45_vm1, 1.0, %v1197_v35  ;;  %v1012_v38 = vsel %vm46_vm2, 1.0, %v1197_v35  ;;  %v1013_v39 = vsel %vm47_vm3, 1.0, %v1197_v35 }
  0x26   :  { %v60_v40 = vmul.f32 %v1010_v36, %v43_v27  ;;  %v61_v41 = vmul.f32 %v1011_v37, %v43_v27  ;;  %v62_v42 = vmul.f32 %v1012_v38, %v43_v27  ;;  %v63_v43 = vmul.f32 %v1013_v39, %v43_v27 }
  0x27   :  { %vm72_vm4 = vcmp.ge.f32.partialorder %v71_v28, %v1231_v23  ;;  %vm73_vm5 = vcmp.ge.f32.partialorder %v71_v28, %v1233_v24  ;;  %vm74_vm6 = vcmp.ge.f32.partialorder %v71_v28, %v1235_v25  ;;  %vm75_vm7 = vcmp.ge.f32.partialorder %v71_v28, %v1237_v26 }
  0x28   :  { %v1014_v44 = vsel %vm72_vm4, 1.0, %v1197_v35  ;;  %v1015_v45 = vsel %vm73_vm5, 1.0, %v1197_v35  ;;  %v1016_v46 = vsel %vm74_vm6, 1.0, %v1197_v35  ;;  %v1017_v47 = vsel %vm75_vm7, 1.0, %v1197_v35 }
  0x29   :  { %v84_v48 = vadd.f32 %v1014_v44, %v1010_v36  ;;  %v85_v49 = vadd.f32 %v1015_v45, %v1011_v37  ;;  %v86_v50 = vadd.f32 %v1016_v46, %v1012_v38  ;;  %v87_v51 = vadd.f32 %v1017_v47, %v1013_v39 }
  0x2a   :  { %v88_v52 = vmul.f32 %v1014_v44, %v71_v28  ;;  %v89_v53 = vmul.f32 %v1015_v45, %v71_v28  ;;  %v90_v54 = vmul.f32 %v1016_v46, %v71_v28  ;;  %v91_v55 = vmul.f32 %v1017_v47, %v71_v28 }
  0x2b   :  { %vm100_vm8 = vcmp.ge.f32.partialorder %v99_v29, %v1231_v23  ;;  %vm101_vm9 = vcmp.ge.f32.partialorder %v99_v29, %v1233_v24  ;;  %vm102_vm10 = vcmp.ge.f32.partialorder %v99_v29, %v1235_v25  ;;  %vm103_vm11 = vcmp.ge.f32.partialorder %v99_v29, %v1237_v26 }
  0x2c   :  { %v92_v56 = vadd.f32 %v88_v52, %v60_v40  ;;  %v93_v57 = vadd.f32 %v89_v53, %v61_v41  ;;  %v94_v58 = vadd.f32 %v90_v54, %v62_v42  ;;  %v95_v59 = vadd.f32 %v91_v55, %v63_v43 }
  0x2d   :  { %v1018_v60 = vsel %vm100_vm8, 1.0, %v1197_v35  ;;  %v1019_v61 = vsel %vm101_vm9, 1.0, %v1197_v35  ;;  %v1020_v62 = vsel %vm102_vm10, 1.0, %v1197_v35  ;;  %v1021_v63 = vsel %vm103_vm11, 1.0, %v1197_v35 }
  0x2e   :  { %v112_v0 = vadd.f32 %v1018_v60, %v84_v48  ;;  %v113_v1 = vadd.f32 %v1019_v61, %v85_v49  ;;  %v114_v2 = vadd.f32 %v1020_v62, %v86_v50  ;;  %v115_v3 = vadd.f32 %v1021_v63, %v87_v51 }
  0x2f   :  { %v116_v4 = vmul.f32 %v1018_v60, %v99_v29  ;;  %v117_v5 = vmul.f32 %v1019_v61, %v99_v29  ;;  %v118_v6 = vmul.f32 %v1020_v62, %v99_v29  ;;  %v119_v7 = vmul.f32 %v1021_v63, %v99_v29 }
  0x30   :  { %vm128_vm12 = vcmp.ge.f32.partialorder %v1247_v30, %v1231_v23  ;;  %vm129_vm13 = vcmp.ge.f32.partialorder %v1247_v30, %v1233_v24  ;;  %vm130_vm14 = vcmp.ge.f32.partialorder %v1247_v30, %v1235_v25  ;;  %vm131_vm15 = vcmp.ge.f32.partialorder %v1247_v30, %v1237_v26 }
  0x31   :  { %v120_v8 = vadd.f32 %v116_v4, %v92_v56  ;;  %v121_v9 = vadd.f32 %v117_v5, %v93_v57  ;;  %v122_v10 = vadd.f32 %v118_v6, %v94_v58  ;;  %v123_v11 = vadd.f32 %v119_v7, %v95_v59 }
  0x32   :  { %v1022_v12 = vsel %vm128_vm12, 1.0, %v1197_v35  ;;  %v1023_v13 = vsel %vm129_vm13, 1.0, %v1197_v35  ;;  %v1024_v15 = vsel %vm130_vm14, 1.0, %v1197_v35  ;;  %v1025_v27 = vsel %vm131_vm15, 1.0, %v1197_v35 }
  0x33   :  { %v140_v28 = vadd.f32 %v1022_v12, %v112_v0  ;;  %v141_v29 = vadd.f32 %v1023_v13, %v113_v1  ;;  %v142_v36 = vadd.f32 %v1024_v15, %v114_v2  ;;  %v143_v37 = vadd.f32 %v1025_v27, %v115_v3 }
  0x34   :  { %v144_v38 = vmul.f32 %v1022_v12, %v1247_v30  ;;  %v145_v39 = vmul.f32 %v1023_v13, %v1247_v30  ;;  %v146_v40 = vmul.f32 %v1024_v15, %v1247_v30  ;;  %v147_v41 = vmul.f32 %v1025_v27, %v1247_v30 }
  0x35   :  { %vm156_vm0 = vcmp.ge.f32.partialorder %v1251_v31, %v1231_v23  ;;  %vm157_vm1 = vcmp.ge.f32.partialorder %v1251_v31, %v1233_v24  ;;  %vm158_vm2 = vcmp.ge.f32.partialorder %v1251_v31, %v1235_v25  ;;  %vm159_vm3 = vcmp.ge.f32.partialorder %v1251_v31, %v1237_v26 }
  0x36   :  { %v148_v42 = vadd.f32 %v144_v38, %v120_v8  ;;  %v149_v43 = vadd.f32 %v145_v39, %v121_v9  ;;  %v150_v44 = vadd.f32 %v146_v40, %v122_v10  ;;  %v151_v45 = vadd.f32 %v147_v41, %v123_v11 }
  0x37   :  { %v1026_v46 = vsel %vm156_vm0, 1.0, %v1197_v35  ;;  %v1027_v30 = vsel %vm157_vm1, 1.0, %v1197_v35  ;;  %v1028_v47 = vsel %vm158_vm2, 1.0, %v1197_v35  ;;  %v1029_v48 = vsel %vm159_vm3, 1.0, %v1197_v35 }
  0x38   :  { %v168_v49 = vadd.f32 %v1026_v46, %v140_v28  ;;  %v169_v50 = vadd.f32 %v1027_v30, %v141_v29  ;;  %v170_v51 = vadd.f32 %v1028_v47, %v142_v36  ;;  %v171_v52 = vadd.f32 %v1029_v48, %v143_v37 }
  0x39   :  { %v172_v53 = vmul.f32 %v1026_v46, %v1251_v31  ;;  %v173_v54 = vmul.f32 %v1027_v30, %v1251_v31  ;;  %v174_v55 = vmul.f32 %v1028_v47, %v1251_v31  ;;  %v175_v56 = vmul.f32 %v1029_v48, %v1251_v31 }
  0x3a   :  { %vm184_vm4 = vcmp.ge.f32.partialorder %v1255_v32, %v1231_v23  ;;  %vm185_vm5 = vcmp.ge.f32.partialorder %v1255_v32, %v1233_v24  ;;  %vm186_vm6 = vcmp.ge.f32.partialorder %v1255_v32, %v1235_v25  ;;  %vm187_vm7 = vcmp.ge.f32.partialorder %v1255_v32, %v1237_v26 }
  0x3b   :  { %v176_v57 = vadd.f32 %v172_v53, %v148_v42  ;;  %v177_v58 = vadd.f32 %v173_v54, %v149_v43  ;;  %v178_v59 = vadd.f32 %v174_v55, %v150_v44  ;;  %v179_v60 = vadd.f32 %v175_v56, %v151_v45 }
  0x3c   :  { %v1030_v61 = vsel %vm184_vm4, 1.0, %v1197_v35  ;;  %v1031_v31 = vsel %vm185_vm5, 1.0, %v1197_v35  ;;  %v1032_v62 = vsel %vm186_vm6, 1.0, %v1197_v35  ;;  %v1033_v63 = vsel %vm187_vm7, 1.0, %v1197_v35 }
  0x3d   :  { %v196_v0 = vadd.f32 %v1030_v61, %v168_v49  ;;  %v197_v1 = vadd.f32 %v1031_v31, %v169_v50  ;;  %v198_v2 = vadd.f32 %v1032_v62, %v170_v51  ;;  %v199_v3 = vadd.f32 %v1033_v63, %v171_v52 }
  0x3e   :  { %v200_v4 = vmul.f32 %v1030_v61, %v1255_v32  ;;  %v201_v5 = vmul.f32 %v1031_v31, %v1255_v32  ;;  %v202_v6 = vmul.f32 %v1032_v62, %v1255_v32  ;;  %v203_v7 = vmul.f32 %v1033_v63, %v1255_v32 }
  0x3f   :  { %vm212_vm8 = vcmp.ge.f32.partialorder %v1259_v33, %v1231_v23  ;;  %vm213_vm9 = vcmp.ge.f32.partialorder %v1259_v33, %v1233_v24  ;;  %vm214_vm10 = vcmp.ge.f32.partialorder %v1259_v33, %v1235_v25  ;;  %vm215_vm11 = vcmp.ge.f32.partialorder %v1259_v33, %v1237_v26 }
  0x40   :  { %v204_v8 = vadd.f32 %v200_v4, %v176_v57  ;;  %v205_v9 = vadd.f32 %v201_v5, %v177_v58  ;;  %v206_v10 = vadd.f32 %v202_v6, %v178_v59  ;;  %v207_v11 = vadd.f32 %v203_v7, %v179_v60 }
  0x41   :  { %v1034_v12 = vsel %vm212_vm8, 1.0, %v1197_v35  ;;  %v1035_v32 = vsel %vm213_vm9, 1.0, %v1197_v35  ;;  %v1036_v13 = vsel %vm214_vm10, 1.0, %v1197_v35  ;;  %v1037_v15 = vsel %vm215_vm11, 1.0, %v1197_v35 }
  0x42   :  { %v224_v27 = vadd.f32 %v1034_v12, %v196_v0  ;;  %v225_v28 = vadd.f32 %v1035_v32, %v197_v1  ;;  %v226_v29 = vadd.f32 %v1036_v13, %v198_v2  ;;  %v227_v36 = vadd.f32 %v1037_v15, %v199_v3 }
  0x43   :  { %v228_v37 = vmul.f32 %v1034_v12, %v1259_v33  ;;  %v229_v38 = vmul.f32 %v1035_v32, %v1259_v33  ;;  %v230_v39 = vmul.f32 %v1036_v13, %v1259_v33  ;;  %v231_v40 = vmul.f32 %v1037_v15, %v1259_v33 }
  0x44   :  { %vm240_vm12 = vcmp.ge.f32.partialorder %v1263_v34, %v1231_v23  ;;  %vm241_vm13 = vcmp.ge.f32.partialorder %v1263_v34, %v1233_v24  ;;  %vm242_vm14 = vcmp.ge.f32.partialorder %v1263_v34, %v1235_v25  ;;  %vm243_vm15 = vcmp.ge.f32.partialorder %v1263_v34, %v1237_v26 }
  0x45   :  { %v232_v41 = vadd.f32 %v228_v37, %v204_v8  ;;  %v233_v42 = vadd.f32 %v229_v38, %v205_v9  ;;  %v234_v43 = vadd.f32 %v230_v39, %v206_v10  ;;  %v235_v44 = vadd.f32 %v231_v40, %v207_v11 }
  0x46   :  { %v1038_v45 = vsel %vm240_vm12, 1.0, %v1197_v35  ;;  %v1039_v33 = vsel %vm241_vm13, 1.0, %v1197_v35  ;;  %v1040_v46 = vsel %vm242_vm14, 1.0, %v1197_v35  ;;  %v1041_v30 = vsel %vm243_vm15, 1.0, %v1197_v35 }
  0x47   :  { %v252_v47 = vadd.f32 %v1038_v45, %v224_v27  ;;  %v253_v48 = vadd.f32 %v1039_v33, %v225_v28  ;;  %v254_v49 = vadd.f32 %v1040_v46, %v226_v29  ;;  %v255_v50 = vadd.f32 %v1041_v30, %v227_v36 }
  0x48   :  { %v256_v51 = vmul.f32 %v1038_v45, %v1263_v34  ;;  %v257_v52 = vmul.f32 %v1039_v33, %v1263_v34  ;;  %v258_v53 = vmul.f32 %v1040_v46, %v1263_v34  ;;  %v259_v54 = vmul.f32 %v1041_v30, %v1263_v34 }
  0x49   :  { %v267_v55 = vrot.slane %v1233_v24, %v1215_v14  ;;  %v295_v56 = vrot.slane %v1233_v24, %v1217_v16  ;;  %v323_v57 = vrot.slane %v1233_v24, %v1219_v17  ;;  %v1377_v58 = vrot.slane %v1233_v24, %v1221_v18 }
  0x4a   :  { %v260_v59 = vadd.f32 %v256_v51, %v232_v41  ;;  %v261_v60 = vadd.f32 %v257_v52, %v233_v42  ;;  %v262_v61 = vadd.f32 %v258_v53, %v234_v43  ;;  %v263_v31 = vadd.f32 %v259_v54, %v235_v44 }
  0x4b   :  { %vm268_vm0 = vcmp.ge.f32.partialorder %v267_v55, %v1231_v23  ;;  %vm269_vm1 = vcmp.ge.f32.partialorder %v267_v55, %v1233_v24  ;;  %vm270_vm2 = vcmp.ge.f32.partialorder %v267_v55, %v1235_v25  ;;  %vm271_vm3 = vcmp.ge.f32.partialorder %v267_v55, %v1237_v26 }
  0x4c   :  { %v1042_v34 = vsel %vm268_vm0, 1.0, %v1197_v35  ;;  %v1043_v62 = vsel %vm269_vm1, 1.0, %v1197_v35  ;;  %v1044_v63 = vsel %vm270_vm2, 1.0, %v1197_v35  ;;  %v1045_v0 = vsel %vm271_vm3, 1.0, %v1197_v35 }
  0x4d   :  { %v280_v1 = vadd.f32 %v1042_v34, %v252_v47  ;;  %v281_v2 = vadd.f32 %v1043_v62, %v253_v48  ;;  %v282_v3 = vadd.f32 %v1044_v63, %v254_v49  ;;  %v283_v4 = vadd.f32 %v1045_v0, %v255_v50 }
  0x4e   :  { %v284_v5 = vmul.f32 %v1042_v34, %v267_v55  ;;  %v285_v6 = vmul.f32 %v1043_v62, %v267_v55  ;;  %v286_v7 = vmul.f32 %v1044_v63, %v267_v55  ;;  %v287_v8 = vmul.f32 %v1045_v0, %v267_v55 }
  0x4f   :  { %vm296_vm4 = vcmp.ge.f32.partialorder %v295_v56, %v1231_v23  ;;  %vm297_vm5 = vcmp.ge.f32.partialorder %v295_v56, %v1233_v24  ;;  %vm298_vm6 = vcmp.ge.f32.partialorder %v295_v56, %v1235_v25  ;;  %vm299_vm7 = vcmp.ge.f32.partialorder %v295_v56, %v1237_v26 }
  0x50   :  { %v288_v9 = vadd.f32 %v284_v5, %v260_v59  ;;  %v289_v10 = vadd.f32 %v285_v6, %v261_v60  ;;  %v290_v11 = vadd.f32 %v286_v7, %v262_v61  ;;  %v291_v12 = vadd.f32 %v287_v8, %v263_v31 }
  0x51   :  { %v1046_v32 = vsel %vm296_vm4, 1.0, %v1197_v35  ;;  %v1047_v13 = vsel %vm297_vm5, 1.0, %v1197_v35  ;;  %v1048_v15 = vsel %vm298_vm6, 1.0, %v1197_v35  ;;  %v1049_v27 = vsel %vm299_vm7, 1.0, %v1197_v35 }
  0x52   :  { %v308_v28 = vadd.f32 %v1046_v32, %v280_v1  ;;  %v309_v29 = vadd.f32 %v1047_v13, %v281_v2  ;;  %v310_v36 = vadd.f32 %v1048_v15, %v282_v3  ;;  %v311_v37 = vadd.f32 %v1049_v27, %v283_v4 }
  0x53   :  { %v312_v38 = vmul.f32 %v1046_v32, %v295_v56  ;;  %v313_v39 = vmul.f32 %v1047_v13, %v295_v56  ;;  %v314_v40 = vmul.f32 %v1048_v15, %v295_v56  ;;  %v315_v41 = vmul.f32 %v1049_v27, %v295_v56 }
  0x54   :  { %vm324_vm8 = vcmp.ge.f32.partialorder %v323_v57, %v1231_v23  ;;  %vm325_vm9 = vcmp.ge.f32.partialorder %v323_v57, %v1233_v24  ;;  %vm326_vm10 = vcmp.ge.f32.partialorder %v323_v57, %v1235_v25  ;;  %vm327_vm11 = vcmp.ge.f32.partialorder %v323_v57, %v1237_v26 }
  0x55   :  { %v316_v42 = vadd.f32 %v312_v38, %v288_v9  ;;  %v317_v43 = vadd.f32 %v313_v39, %v289_v10  ;;  %v318_v44 = vadd.f32 %v314_v40, %v290_v11  ;;  %v319_v45 = vadd.f32 %v315_v41, %v291_v12 }
  0x56   :  { %v1050_v33 = vsel %vm324_vm8, 1.0, %v1197_v35  ;;  %v1051_v46 = vsel %vm325_vm9, 1.0, %v1197_v35  ;;  %v1052_v30 = vsel %vm326_vm10, 1.0, %v1197_v35  ;;  %v1053_v47 = vsel %vm327_vm11, 1.0, %v1197_v35 }
  0x57   :  { %v336_v48 = vadd.f32 %v1050_v33, %v308_v28  ;;  %v337_v49 = vadd.f32 %v1051_v46, %v309_v29  ;;  %v338_v50 = vadd.f32 %v1052_v30, %v310_v36  ;;  %v339_v51 = vadd.f32 %v1053_v47, %v311_v37 }
  0x58   :  { %v340_v52 = vmul.f32 %v1050_v33, %v323_v57  ;;  %v341_v53 = vmul.f32 %v1051_v46, %v323_v57  ;;  %v342_v54 = vmul.f32 %v1052_v30, %v323_v57  ;;  %v343_v55 = vmul.f32 %v1053_v47, %v323_v57 }
  0x59   :  { %vm352_vm12 = vcmp.ge.f32.partialorder %v1377_v58, %v1231_v23  ;;  %vm353_vm13 = vcmp.ge.f32.partialorder %v1377_v58, %v1233_v24  ;;  %vm354_vm14 = vcmp.ge.f32.partialorder %v1377_v58, %v1235_v25  ;;  %vm355_vm15 = vcmp.ge.f32.partialorder %v1377_v58, %v1237_v26 }
  0x5a   :  { %v344_v56 = vadd.f32 %v340_v52, %v316_v42  ;;  %v345_v59 = vadd.f32 %v341_v53, %v317_v43  ;;  %v346_v60 = vadd.f32 %v342_v54, %v318_v44  ;;  %v347_v61 = vadd.f32 %v343_v55, %v319_v45 }
  0x5b   :  { %v1054_v31 = vsel %vm352_vm12, 1.0, %v1197_v35  ;;  %v1055_v57 = vsel %vm353_vm13, 1.0, %v1197_v35  ;;  %v1056_v34 = vsel %vm354_vm14, 1.0, %v1197_v35  ;;  %v1057_v62 = vsel %vm355_vm15, 1.0, %v1197_v35 }
  0x5c   :  { %v364_v63 = vadd.f32 %v1054_v31, %v336_v48  ;;  %v365_v0 = vadd.f32 %v1055_v57, %v337_v49  ;;  %v366_v1 = vadd.f32 %v1056_v34, %v338_v50  ;;  %v367_v2 = vadd.f32 %v1057_v62, %v339_v51 }
  0x5d   :  { %v368_v3 = vmul.f32 %v1054_v31, %v1377_v58  ;;  %v369_v4 = vmul.f32 %v1055_v57, %v1377_v58  ;;  %v370_v5 = vmul.f32 %v1056_v34, %v1377_v58  ;;  %v371_v6 = vmul.f32 %v1057_v62, %v1377_v58 }
  0x5e   :  { %v379_v7 = vrot.slane %v1233_v24, %v1223_v19  ;;  %v407_v8 = vrot.slane %v1233_v24, %v1225_v20  ;;  %v435_v9 = vrot.slane %v1233_v24, %v1227_v21  ;;  %v1427_v10 = vrot.slane %v1233_v24, %v1229_v22 }
  0x5f   :  { %v372_v11 = vadd.f32 %v368_v3, %v344_v56  ;;  %v373_v12 = vadd.f32 %v369_v4, %v345_v59  ;;  %v374_v32 = vadd.f32 %v370_v5, %v346_v60  ;;  %v375_v13 = vadd.f32 %v371_v6, %v347_v61 }
  0x60   :  { %vm380_vm0 = vcmp.ge.f32.partialorder %v379_v7, %v1231_v23  ;;  %vm381_vm1 = vcmp.ge.f32.partialorder %v379_v7, %v1233_v24  ;;  %vm382_vm2 = vcmp.ge.f32.partialorder %v379_v7, %v1235_v25  ;;  %vm383_vm3 = vcmp.ge.f32.partialorder %v379_v7, %v1237_v26 }
  0x61   :  { %v1058_v58 = vsel %vm380_vm0, 1.0, %v1197_v35  ;;  %v1059_v15 = vsel %vm381_vm1, 1.0, %v1197_v35  ;;  %v1060_v27 = vsel %vm382_vm2, 1.0, %v1197_v35  ;;  %v1061_v28 = vsel %vm383_vm3, 1.0, %v1197_v35 }
  0x62   :  { %v392_v29 = vadd.f32 %v1058_v58, %v364_v63  ;;  %v393_v36 = vadd.f32 %v1059_v15, %v365_v0  ;;  %v394_v37 = vadd.f32 %v1060_v27, %v366_v1  ;;  %v395_v38 = vadd.f32 %v1061_v28, %v367_v2 }
  0x63   :  { %v396_v39 = vmul.f32 %v1058_v58, %v379_v7  ;;  %v397_v40 = vmul.f32 %v1059_v15, %v379_v7  ;;  %v398_v41 = vmul.f32 %v1060_v27, %v379_v7  ;;  %v399_v42 = vmul.f32 %v1061_v28, %v379_v7 }
  0x64   :  { %vm408_vm4 = vcmp.ge.f32.partialorder %v407_v8, %v1231_v23  ;;  %vm409_vm5 = vcmp.ge.f32.partialorder %v407_v8, %v1233_v24  ;;  %vm410_vm6 = vcmp.ge.f32.partialorder %v407_v8, %v1235_v25  ;;  %vm411_vm7 = vcmp.ge.f32.partialorder %v407_v8, %v1237_v26 }
  0x65   :  { %v400_v43 = vadd.f32 %v396_v39, %v372_v11  ;;  %v401_v44 = vadd.f32 %v397_v40, %v373_v12  ;;  %v402_v45 = vadd.f32 %v398_v41, %v374_v32  ;;  %v403_v33 = vadd.f32 %v399_v42, %v375_v13 }
  0x66   :  { %v1062_v46 = vsel %vm408_vm4, 1.0, %v1197_v35  ;;  %v1063_v30 = vsel %vm409_vm5, 1.0, %v1197_v35  ;;  %v1064_v47 = vsel %vm410_vm6, 1.0, %v1197_v35  ;;  %v1065_v48 = vsel %vm411_vm7, 1.0, %v1197_v35 }
  0x67   :  { %v420_v49 = vadd.f32 %v1062_v46, %v392_v29  ;;  %v421_v50 = vadd.f32 %v1063_v30, %v393_v36  ;;  %v422_v51 = vadd.f32 %v1064_v47, %v394_v37  ;;  %v423_v52 = vadd.f32 %v1065_v48, %v395_v38 }
  0x68   :  { %v424_v53 = vmul.f32 %v1062_v46, %v407_v8  ;;  %v425_v54 = vmul.f32 %v1063_v30, %v407_v8  ;;  %v426_v55 = vmul.f32 %v1064_v47, %v407_v8  ;;  %v427_v56 = vmul.f32 %v1065_v48, %v407_v8 }
  0x69   :  { %vm436_vm8 = vcmp.ge.f32.partialorder %v435_v9, %v1231_v23  ;;  %vm437_vm9 = vcmp.ge.f32.partialorder %v435_v9, %v1233_v24  ;;  %vm438_vm10 = vcmp.ge.f32.partialorder %v435_v9, %v1235_v25  ;;  %vm439_vm11 = vcmp.ge.f32.partialorder %v435_v9, %v1237_v26 }
  0x6a   :  { %v428_v59 = vadd.f32 %v424_v53, %v400_v43  ;;  %v429_v60 = vadd.f32 %v425_v54, %v401_v44  ;;  %v430_v61 = vadd.f32 %v426_v55, %v402_v45  ;;  %v431_v31 = vadd.f32 %v427_v56, %v403_v33 }
  0x6b   :  { %v1066_v57 = vsel %vm436_vm8, 1.0, %v1197_v35  ;;  %v1067_v34 = vsel %vm437_vm9, 1.0, %v1197_v35  ;;  %v1068_v62 = vsel %vm438_vm10, 1.0, %v1197_v35  ;;  %v1069_v63 = vsel %vm439_vm11, 1.0, %v1197_v35 }
  0x6c   :  { %v448_v0 = vadd.f32 %v1066_v57, %v420_v49  ;;  %v449_v1 = vadd.f32 %v1067_v34, %v421_v50  ;;  %v450_v2 = vadd.f32 %v1068_v62, %v422_v51  ;;  %v451_v3 = vadd.f32 %v1069_v63, %v423_v52 }
  0x6d   :  { %v452_v4 = vmul.f32 %v1066_v57, %v435_v9  ;;  %v453_v5 = vmul.f32 %v1067_v34, %v435_v9  ;;  %v454_v6 = vmul.f32 %v1068_v62, %v435_v9  ;;  %v455_v7 = vmul.f32 %v1069_v63, %v435_v9 }
  0x6e   :  { %vm464_vm12 = vcmp.ge.f32.partialorder %v1427_v10, %v1231_v23  ;;  %vm465_vm13 = vcmp.ge.f32.partialorder %v1427_v10, %v1233_v24  ;;  %vm466_vm14 = vcmp.ge.f32.partialorder %v1427_v10, %v1235_v25  ;;  %vm467_vm15 = vcmp.ge.f32.partialorder %v1427_v10, %v1237_v26 }
  0x6f   :  { %v456_v8 = vadd.f32 %v452_v4, %v428_v59  ;;  %v457_v11 = vadd.f32 %v453_v5, %v429_v60  ;;  %v458_v12 = vadd.f32 %v454_v6, %v430_v61  ;;  %v459_v32 = vadd.f32 %v455_v7, %v431_v31 }
  0x70   :  { %v1070_v13 = vsel %vm464_vm12, 1.0, %v1197_v35  ;;  %v1071_v9 = vsel %vm465_vm13, 1.0, %v1197_v35  ;;  %v1072_v58 = vsel %vm466_vm14, 1.0, %v1197_v35  ;;  %v1073_v15 = vsel %vm467_vm15, 1.0, %v1197_v35 }
  0x71   :  { %v476_v27 = vadd.f32 %v1070_v13, %v448_v0  ;;  %v477_v28 = vadd.f32 %v1071_v9, %v449_v1  ;;  %v478_v29 = vadd.f32 %v1072_v58, %v450_v2  ;;  %v479_v36 = vadd.f32 %v1073_v15, %v451_v3 }
  0x72   :  { %v480_v37 = vmul.f32 %v1070_v13, %v1427_v10  ;;  %v481_v38 = vmul.f32 %v1071_v9, %v1427_v10  ;;  %v482_v39 = vmul.f32 %v1072_v58, %v1427_v10  ;;  %v483_v40 = vmul.f32 %v1073_v15, %v1427_v10 }
  0x73   :  { %v491_v41 = vrot.slane %v1235_v25, %v1215_v14  ;;  %v519_v42 = vrot.slane %v1235_v25, %v1217_v16  ;;  %v547_v43 = vrot.slane %v1235_v25, %v1219_v17  ;;  %v1477_v44 = vrot.slane %v1235_v25, %v1221_v18 }
  0x74   :  { %v484_v45 = vadd.f32 %v480_v37, %v456_v8  ;;  %v485_v33 = vadd.f32 %v481_v38, %v457_v11  ;;  %v486_v46 = vadd.f32 %v482_v39, %v458_v12  ;;  %v487_v30 = vadd.f32 %v483_v40, %v459_v32 }
  0x75   :  { %vm492_vm0 = vcmp.ge.f32.partialorder %v491_v41, %v1231_v23  ;;  %vm493_vm1 = vcmp.ge.f32.partialorder %v491_v41, %v1233_v24  ;;  %vm494_vm2 = vcmp.ge.f32.partialorder %v491_v41, %v1235_v25  ;;  %vm495_vm3 = vcmp.ge.f32.partialorder %v491_v41, %v1237_v26 }
  0x76   :  { %v1074_v10 = vsel %vm492_vm0, 1.0, %v1197_v35  ;;  %v1075_v47 = vsel %vm493_vm1, 1.0, %v1197_v35  ;;  %v1076_v48 = vsel %vm494_vm2, 1.0, %v1197_v35  ;;  %v1077_v49 = vsel %vm495_vm3, 1.0, %v1197_v35 }
  0x77   :  { %v504_v50 = vadd.f32 %v1074_v10, %v476_v27  ;;  %v505_v51 = vadd.f32 %v1075_v47, %v477_v28  ;;  %v506_v52 = vadd.f32 %v1076_v48, %v478_v29  ;;  %v507_v53 = vadd.f32 %v1077_v49, %v479_v36 }
  0x78   :  { %v508_v54 = vmul.f32 %v1074_v10, %v491_v41  ;;  %v509_v55 = vmul.f32 %v1075_v47, %v491_v41  ;;  %v510_v56 = vmul.f32 %v1076_v48, %v491_v41  ;;  %v511_v59 = vmul.f32 %v1077_v49, %v491_v41 }
  0x79   :  { %vm520_vm4 = vcmp.ge.f32.partialorder %v519_v42, %v1231_v23  ;;  %vm521_vm5 = vcmp.ge.f32.partialorder %v519_v42, %v1233_v24  ;;  %vm522_vm6 = vcmp.ge.f32.partialorder %v519_v42, %v1235_v25  ;;  %vm523_vm7 = vcmp.ge.f32.partialorder %v519_v42, %v1237_v26 }
  0x7a   :  { %v512_v60 = vadd.f32 %v508_v54, %v484_v45  ;;  %v513_v61 = vadd.f32 %v509_v55, %v485_v33  ;;  %v514_v31 = vadd.f32 %v510_v56, %v486_v46  ;;  %v515_v57 = vadd.f32 %v511_v59, %v487_v30 }
  0x7b   :  { %v1078_v34 = vsel %vm520_vm4, 1.0, %v1197_v35  ;;  %v1079_v62 = vsel %vm521_vm5, 1.0, %v1197_v35  ;;  %v1080_v63 = vsel %vm522_vm6, 1.0, %v1197_v35  ;;  %v1081_v0 = vsel %vm523_vm7, 1.0, %v1197_v35 }
  0x7c   :  { %v532_v1 = vadd.f32 %v1078_v34, %v504_v50  ;;  %v533_v2 = vadd.f32 %v1079_v62, %v505_v51  ;;  %v534_v3 = vadd.f32 %v1080_v63, %v506_v52  ;;  %v535_v4 = vadd.f32 %v1081_v0, %v507_v53 }
  0x7d   :  { %v536_v5 = vmul.f32 %v1078_v34, %v519_v42  ;;  %v537_v6 = vmul.f32 %v1079_v62, %v519_v42  ;;  %v538_v7 = vmul.f32 %v1080_v63, %v519_v42  ;;  %v539_v8 = vmul.f32 %v1081_v0, %v519_v42 }
  0x7e   :  { %vm548_vm8 = vcmp.ge.f32.partialorder %v547_v43, %v1231_v23  ;;  %vm549_vm9 = vcmp.ge.f32.partialorder %v547_v43, %v1233_v24  ;;  %vm550_vm10 = vcmp.ge.f32.partialorder %v547_v43, %v1235_v25  ;;  %vm551_vm11 = vcmp.ge.f32.partialorder %v547_v43, %v1237_v26 }
  0x7f   :  { %v540_v11 = vadd.f32 %v536_v5, %v512_v60  ;;  %v541_v12 = vadd.f32 %v537_v6, %v513_v61  ;;  %v542_v32 = vadd.f32 %v538_v7, %v514_v31  ;;  %v543_v13 = vadd.f32 %v539_v8, %v515_v57 }
  0x80   :  { %v1082_v9 = vsel %vm548_vm8, 1.0, %v1197_v35  ;;  %v1083_v58 = vsel %vm549_vm9, 1.0, %v1197_v35  ;;  %v1084_v15 = vsel %vm550_vm10, 1.0, %v1197_v35  ;;  %v1085_v27 = vsel %vm551_vm11, 1.0, %v1197_v35 }
  0x81   :  { %v560_v28 = vadd.f32 %v1082_v9, %v532_v1  ;;  %v561_v29 = vadd.f32 %v1083_v58, %v533_v2  ;;  %v562_v36 = vadd.f32 %v1084_v15, %v534_v3  ;;  %v563_v37 = vadd.f32 %v1085_v27, %v535_v4 }
  0x82   :  { %v564_v38 = vmul.f32 %v1082_v9, %v547_v43  ;;  %v565_v39 = vmul.f32 %v1083_v58, %v547_v43  ;;  %v566_v40 = vmul.f32 %v1084_v15, %v547_v43  ;;  %v567_v41 = vmul.f32 %v1085_v27, %v547_v43 }
  0x83   :  { %vm576_vm12 = vcmp.ge.f32.partialorder %v1477_v44, %v1231_v23  ;;  %vm577_vm13 = vcmp.ge.f32.partialorder %v1477_v44, %v1233_v24  ;;  %vm578_vm14 = vcmp.ge.f32.partialorder %v1477_v44, %v1235_v25  ;;  %vm579_vm15 = vcmp.ge.f32.partialorder %v1477_v44, %v1237_v26 }
  0x84   :  { %v568_v42 = vadd.f32 %v564_v38, %v540_v11  ;;  %v569_v45 = vadd.f32 %v565_v39, %v541_v12  ;;  %v570_v33 = vadd.f32 %v566_v40, %v542_v32  ;;  %v571_v46 = vadd.f32 %v567_v41, %v543_v13 }
  0x85   :  { %v1086_v30 = vsel %vm576_vm12, 1.0, %v1197_v35  ;;  %v1087_v43 = vsel %vm577_vm13, 1.0, %v1197_v35  ;;  %v1088_v10 = vsel %vm578_vm14, 1.0, %v1197_v35  ;;  %v1089_v47 = vsel %vm579_vm15, 1.0, %v1197_v35 }
  0x86   :  { %v588_v48 = vadd.f32 %v1086_v30, %v560_v28  ;;  %v589_v49 = vadd.f32 %v1087_v43, %v561_v29  ;;  %v590_v50 = vadd.f32 %v1088_v10, %v562_v36  ;;  %v591_v51 = vadd.f32 %v1089_v47, %v563_v37 }
  0x87   :  { %v592_v52 = vmul.f32 %v1086_v30, %v1477_v44  ;;  %v593_v53 = vmul.f32 %v1087_v43, %v1477_v44  ;;  %v594_v54 = vmul.f32 %v1088_v10, %v1477_v44  ;;  %v595_v55 = vmul.f32 %v1089_v47, %v1477_v44 }
  0x88   :  { %v603_v56 = vrot.slane %v1235_v25, %v1223_v19  ;;  %v631_v59 = vrot.slane %v1235_v25, %v1225_v20  ;;  %v659_v60 = vrot.slane %v1235_v25, %v1227_v21  ;;  %v1527_v61 = vrot.slane %v1235_v25, %v1229_v22 }
  0x89   :  { %v596_v31 = vadd.f32 %v592_v52, %v568_v42  ;;  %v597_v57 = vadd.f32 %v593_v53, %v569_v45  ;;  %v598_v34 = vadd.f32 %v594_v54, %v570_v33  ;;  %v599_v62 = vadd.f32 %v595_v55, %v571_v46 }
  0x8a   :  { %vm604_vm0 = vcmp.ge.f32.partialorder %v603_v56, %v1231_v23  ;;  %vm605_vm1 = vcmp.ge.f32.partialorder %v603_v56, %v1233_v24  ;;  %vm606_vm2 = vcmp.ge.f32.partialorder %v603_v56, %v1235_v25  ;;  %vm607_vm3 = vcmp.ge.f32.partialorder %v603_v56, %v1237_v26 }
  0x8b   :  { %v1090_v44 = vsel %vm604_vm0, 1.0, %v1197_v35  ;;  %v1091_v63 = vsel %vm605_vm1, 1.0, %v1197_v35  ;;  %v1092_v0 = vsel %vm606_vm2, 1.0, %v1197_v35  ;;  %v1093_v1 = vsel %vm607_vm3, 1.0, %v1197_v35 }
  0x8c   :  { %v616_v2 = vadd.f32 %v1090_v44, %v588_v48  ;;  %v617_v3 = vadd.f32 %v1091_v63, %v589_v49  ;;  %v618_v4 = vadd.f32 %v1092_v0, %v590_v50  ;;  %v619_v5 = vadd.f32 %v1093_v1, %v591_v51 }
  0x8d   :  { %v620_v6 = vmul.f32 %v1090_v44, %v603_v56  ;;  %v621_v7 = vmul.f32 %v1091_v63, %v603_v56  ;;  %v622_v8 = vmul.f32 %v1092_v0, %v603_v56  ;;  %v623_v11 = vmul.f32 %v1093_v1, %v603_v56 }
  0x8e   :  { %vm632_vm4 = vcmp.ge.f32.partialorder %v631_v59, %v1231_v23  ;;  %vm633_vm5 = vcmp.ge.f32.partialorder %v631_v59, %v1233_v24  ;;  %vm634_vm6 = vcmp.ge.f32.partialorder %v631_v59, %v1235_v25  ;;  %vm635_vm7 = vcmp.ge.f32.partialorder %v631_v59, %v1237_v26 }
  0x8f   :  { %v624_v12 = vadd.f32 %v620_v6, %v596_v31  ;;  %v625_v32 = vadd.f32 %v621_v7, %v597_v57  ;;  %v626_v13 = vadd.f32 %v622_v8, %v598_v34  ;;  %v627_v9 = vadd.f32 %v623_v11, %v599_v62 }
  0x90   :  { %v1094_v58 = vsel %vm632_vm4, 1.0, %v1197_v35  ;;  %v1095_v15 = vsel %vm633_vm5, 1.0, %v1197_v35  ;;  %v1096_v27 = vsel %vm634_vm6, 1.0, %v1197_v35  ;;  %v1097_v28 = vsel %vm635_vm7, 1.0, %v1197_v35 }
  0x91   :  { %v644_v29 = vadd.f32 %v1094_v58, %v616_v2  ;;  %v645_v36 = vadd.f32 %v1095_v15, %v617_v3  ;;  %v646_v37 = vadd.f32 %v1096_v27, %v618_v4  ;;  %v647_v38 = vadd.f32 %v1097_v28, %v619_v5 }
  0x92   :  { %v648_v39 = vmul.f32 %v1094_v58, %v631_v59  ;;  %v649_v40 = vmul.f32 %v1095_v15, %v631_v59  ;;  %v650_v41 = vmul.f32 %v1096_v27, %v631_v59  ;;  %v651_v42 = vmul.f32 %v1097_v28, %v631_v59 }
  0x93   :  { %vm660_vm8 = vcmp.ge.f32.partialorder %v659_v60, %v1231_v23  ;;  %vm661_vm9 = vcmp.ge.f32.partialorder %v659_v60, %v1233_v24  ;;  %vm662_vm10 = vcmp.ge.f32.partialorder %v659_v60, %v1235_v25  ;;  %vm663_vm11 = vcmp.ge.f32.partialorder %v659_v60, %v1237_v26 }
  0x94   :  { %v652_v45 = vadd.f32 %v648_v39, %v624_v12  ;;  %v653_v33 = vadd.f32 %v649_v40, %v625_v32  ;;  %v654_v46 = vadd.f32 %v650_v41, %v626_v13  ;;  %v655_v30 = vadd.f32 %v651_v42, %v627_v9 }
  0x95   :  { %v1098_v43 = vsel %vm660_vm8, 1.0, %v1197_v35  ;;  %v1099_v10 = vsel %vm661_vm9, 1.0, %v1197_v35  ;;  %v1100_v47 = vsel %vm662_vm10, 1.0, %v1197_v35  ;;  %v1101_v48 = vsel %vm663_vm11, 1.0, %v1197_v35 }
  0x96   :  { %v672_v49 = vadd.f32 %v1098_v43, %v644_v29  ;;  %v673_v50 = vadd.f32 %v1099_v10, %v645_v36  ;;  %v674_v51 = vadd.f32 %v1100_v47, %v646_v37  ;;  %v675_v52 = vadd.f32 %v1101_v48, %v647_v38 }
  0x97   :  { %v676_v53 = vmul.f32 %v1098_v43, %v659_v60  ;;  %v677_v54 = vmul.f32 %v1099_v10, %v659_v60  ;;  %v678_v55 = vmul.f32 %v1100_v47, %v659_v60  ;;  %v679_v56 = vmul.f32 %v1101_v48, %v659_v60 }
  0x98   :  { %vm688_vm12 = vcmp.ge.f32.partialorder %v1527_v61, %v1231_v23  ;;  %vm689_vm13 = vcmp.ge.f32.partialorder %v1527_v61, %v1233_v24  ;;  %vm690_vm14 = vcmp.ge.f32.partialorder %v1527_v61, %v1235_v25  ;;  %vm691_vm15 = vcmp.ge.f32.partialorder %v1527_v61, %v1237_v26 }
  0x99   :  { %v680_v59 = vadd.f32 %v676_v53, %v652_v45  ;;  %v681_v31 = vadd.f32 %v677_v54, %v653_v33  ;;  %v682_v57 = vadd.f32 %v678_v55, %v654_v46  ;;  %v683_v34 = vadd.f32 %v679_v56, %v655_v30 }
  0x9a   :  { %v1102_v62 = vsel %vm688_vm12, 1.0, %v1197_v35  ;;  %v1103_v60 = vsel %vm689_vm13, 1.0, %v1197_v35  ;;  %v1104_v44 = vsel %vm690_vm14, 1.0, %v1197_v35  ;;  %v1105_v63 = vsel %vm691_vm15, 1.0, %v1197_v35 }
  0x9b   :  { %v700_v0 = vadd.f32 %v1102_v62, %v672_v49  ;;  %v701_v1 = vadd.f32 %v1103_v60, %v673_v50  ;;  %v702_v2 = vadd.f32 %v1104_v44, %v674_v51  ;;  %v703_v3 = vadd.f32 %v1105_v63, %v675_v52 }
  0x9c   :  { %v704_v4 = vmul.f32 %v1102_v62, %v1527_v61  ;;  %v705_v5 = vmul.f32 %v1103_v60, %v1527_v61  ;;  %v706_v6 = vmul.f32 %v1104_v44, %v1527_v61  ;;  %v707_v7 = vmul.f32 %v1105_v63, %v1527_v61 }
  0x9d   :  { %v715_v8 = vrot.slane %v1237_v26, %v1215_v14  ;;  %v743_v11 = vrot.slane %v1237_v26, %v1217_v16  ;;  %v771_v12 = vrot.slane %v1237_v26, %v1219_v17  ;;  %v1577_v32 = vrot.slane %v1237_v26, %v1221_v18 }
  0x9e   :  { %v708_v13 = vadd.f32 %v704_v4, %v680_v59  ;;  %v709_v9 = vadd.f32 %v705_v5, %v681_v31  ;;  %v710_v58 = vadd.f32 %v706_v6, %v682_v57  ;;  %v711_v15 = vadd.f32 %v707_v7, %v683_v34 }
  0x9f   :  { %vm716_vm0 = vcmp.ge.f32.partialorder %v715_v8, %v1231_v23  ;;  %vm717_vm1 = vcmp.ge.f32.partialorder %v715_v8, %v1233_v24  ;;  %vm718_vm2 = vcmp.ge.f32.partialorder %v715_v8, %v1235_v25  ;;  %vm719_vm3 = vcmp.ge.f32.partialorder %v715_v8, %v1237_v26 }
  0xa0   :  { %v1106_v14 = vsel %vm716_vm0, 1.0, %v1197_v35  ;;  %v1107_v16 = vsel %vm717_vm1, 1.0, %v1197_v35  ;;  %v1108_v17 = vsel %vm718_vm2, 1.0, %v1197_v35  ;;  %v1109_v18 = vsel %vm719_vm3, 1.0, %v1197_v35 }
  0xa1   :  { %v728_v61 = vadd.f32 %v1106_v14, %v700_v0  ;;  %v729_v27 = vadd.f32 %v1107_v16, %v701_v1  ;;  %v730_v28 = vadd.f32 %v1108_v17, %v702_v2  ;;  %v731_v29 = vadd.f32 %v1109_v18, %v703_v3 }
  0xa2   :  { %v732_v36 = vmul.f32 %v1106_v14, %v715_v8  ;;  %v733_v37 = vmul.f32 %v1107_v16, %v715_v8  ;;  %v734_v38 = vmul.f32 %v1108_v17, %v715_v8  ;;  %v735_v39 = vmul.f32 %v1109_v18, %v715_v8 }
  0xa3   :  { %vm744_vm4 = vcmp.ge.f32.partialorder %v743_v11, %v1231_v23  ;;  %vm745_vm5 = vcmp.ge.f32.partialorder %v743_v11, %v1233_v24  ;;  %vm746_vm6 = vcmp.ge.f32.partialorder %v743_v11, %v1235_v25  ;;  %vm747_vm7 = vcmp.ge.f32.partialorder %v743_v11, %v1237_v26 }
  0xa4   :  { %v736_v40 = vadd.f32 %v732_v36, %v708_v13  ;;  %v737_v41 = vadd.f32 %v733_v37, %v709_v9  ;;  %v738_v42 = vadd.f32 %v734_v38, %v710_v58  ;;  %v739_v45 = vadd.f32 %v735_v39, %v711_v15 }
  0xa5   :  { %v1110_v33 = vsel %vm744_vm4, 1.0, %v1197_v35  ;;  %v1111_v46 = vsel %vm745_vm5, 1.0, %v1197_v35  ;;  %v1112_v30 = vsel %vm746_vm6, 1.0, %v1197_v35  ;;  %v1113_v43 = vsel %vm747_vm7, 1.0, %v1197_v35 }
  0xa6   :  { %v756_v10 = vadd.f32 %v1110_v33, %v728_v61  ;;  %v757_v47 = vadd.f32 %v1111_v46, %v729_v27  ;;  %v758_v48 = vadd.f32 %v1112_v30, %v730_v28  ;;  %v759_v49 = vadd.f32 %v1113_v43, %v731_v29 }
  0xa7   :  { %v760_v50 = vmul.f32 %v1110_v33, %v743_v11  ;;  %v761_v51 = vmul.f32 %v1111_v46, %v743_v11  ;;  %v762_v52 = vmul.f32 %v1112_v30, %v743_v11  ;;  %v763_v53 = vmul.f32 %v1113_v43, %v743_v11 }
  0xa8   :  { %vm772_vm8 = vcmp.ge.f32.partialorder %v771_v12, %v1231_v23  ;;  %vm773_vm9 = vcmp.ge.f32.partialorder %v771_v12, %v1233_v24  ;;  %vm774_vm10 = vcmp.ge.f32.partialorder %v771_v12, %v1235_v25  ;;  %vm775_vm11 = vcmp.ge.f32.partialorder %v771_v12, %v1237_v26 }
  0xa9   :  { %v764_v54 = vadd.f32 %v760_v50, %v736_v40  ;;  %v765_v55 = vadd.f32 %v761_v51, %v737_v41  ;;  %v766_v56 = vadd.f32 %v762_v52, %v738_v42  ;;  %v767_v59 = vadd.f32 %v763_v53, %v739_v45 }
  0xaa   :  { %v1114_v31 = vsel %vm772_vm8, 1.0, %v1197_v35  ;;  %v1115_v57 = vsel %vm773_vm9, 1.0, %v1197_v35  ;;  %v1116_v34 = vsel %vm774_vm10, 1.0, %v1197_v35  ;;  %v1117_v62 = vsel %vm775_vm11, 1.0, %v1197_v35 }
  0xab   :  { %v784_v60 = vadd.f32 %v1114_v31, %v756_v10  ;;  %v785_v44 = vadd.f32 %v1115_v57, %v757_v47  ;;  %v786_v63 = vadd.f32 %v1116_v34, %v758_v48  ;;  %v787_v0 = vadd.f32 %v1117_v62, %v759_v49 }
  0xac   :  { %v788_v1 = vmul.f32 %v1114_v31, %v771_v12  ;;  %v789_v2 = vmul.f32 %v1115_v57, %v771_v12  ;;  %v790_v3 = vmul.f32 %v1116_v34, %v771_v12  ;;  %v791_v4 = vmul.f32 %v1117_v62, %v771_v12 }
  0xad   :  { %vm800_vm12 = vcmp.ge.f32.partialorder %v1577_v32, %v1231_v23  ;;  %vm801_vm13 = vcmp.ge.f32.partialorder %v1577_v32, %v1233_v24  ;;  %vm802_vm14 = vcmp.ge.f32.partialorder %v1577_v32, %v1235_v25  ;;  %vm803_vm15 = vcmp.ge.f32.partialorder %v1577_v32, %v1237_v26 }
  0xae   :  { %v792_v5 = vadd.f32 %v788_v1, %v764_v54  ;;  %v793_v6 = vadd.f32 %v789_v2, %v765_v55  ;;  %v794_v7 = vadd.f32 %v790_v3, %v766_v56  ;;  %v795_v8 = vadd.f32 %v791_v4, %v767_v59 }
  0xaf   :  { %v1118_v11 = vsel %vm800_vm12, 1.0, %v1197_v35  ;;  %v1119_v12 = vsel %vm801_vm13, 1.0, %v1197_v35  ;;  %v1120_v13 = vsel %vm802_vm14, 1.0, %v1197_v35  ;;  %v1121_v9 = vsel %vm803_vm15, 1.0, %v1197_v35 }
  0xb0   :  { %v812_v58 = vadd.f32 %v1118_v11, %v784_v60  ;;  %v813_v15 = vadd.f32 %v1119_v12, %v785_v44  ;;  %v814_v14 = vadd.f32 %v1120_v13, %v786_v63  ;;  %v815_v16 = vadd.f32 %v1121_v9, %v787_v0 }
  0xb1   :  { %v816_v17 = vmul.f32 %v1118_v11, %v1577_v32  ;;  %v817_v18 = vmul.f32 %v1119_v12, %v1577_v32  ;;  %v818_v61 = vmul.f32 %v1120_v13, %v1577_v32  ;;  %v819_v27 = vmul.f32 %v1121_v9, %v1577_v32 }
  0xb2   :  { %v827_v28 = vrot.slane %v1237_v26, %v1223_v19  ;;  %v855_v29 = vrot.slane %v1237_v26, %v1225_v20  ;;  %v883_v36 = vrot.slane %v1237_v26, %v1227_v21  ;;  %v1627_v37 = vrot.slane %v1237_v26, %v1229_v22 }
  0xb3   :  { %v820_v38 = vadd.f32 %v816_v17, %v792_v5  ;;  %v821_v39 = vadd.f32 %v817_v18, %v793_v6  ;;  %v822_v40 = vadd.f32 %v818_v61, %v794_v7  ;;  %v823_v41 = vadd.f32 %v819_v27, %v795_v8 }
  0xb4   :  { %vm828_vm0 = vcmp.ge.f32.partialorder %v827_v28, %v1231_v23  ;;  %vm829_vm1 = vcmp.ge.f32.partialorder %v827_v28, %v1233_v24  ;;  %vm830_vm2 = vcmp.ge.f32.partialorder %v827_v28, %v1235_v25  ;;  %vm831_vm3 = vcmp.ge.f32.partialorder %v827_v28, %v1237_v26 }
  0xb5   :  { %v1122_v19 = vsel %vm828_vm0, 1.0, %v1197_v35  ;;  %v1123_v20 = vsel %vm829_vm1, 1.0, %v1197_v35  ;;  %v1124_v21 = vsel %vm830_vm2, 1.0, %v1197_v35  ;;  %v1125_v22 = vsel %vm831_vm3, 1.0, %v1197_v35 }
  0xb6   :  { %v840_v32 = vadd.f32 %v1122_v19, %v812_v58  ;;  %v841_v42 = vadd.f32 %v1123_v20, %v813_v15  ;;  %v842_v45 = vadd.f32 %v1124_v21, %v814_v14  ;;  %v843_v33 = vadd.f32 %v1125_v22, %v815_v16 }
  0xb7   :  { %v844_v46 = vmul.f32 %v1122_v19, %v827_v28  ;;  %v845_v30 = vmul.f32 %v1123_v20, %v827_v28  ;;  %v846_v43 = vmul.f32 %v1124_v21, %v827_v28  ;;  %v847_v10 = vmul.f32 %v1125_v22, %v827_v28 }
  0xb8   :  { %vm856_vm4 = vcmp.ge.f32.partialorder %v855_v29, %v1231_v23  ;;  %vm857_vm5 = vcmp.ge.f32.partialorder %v855_v29, %v1233_v24  ;;  %vm858_vm6 = vcmp.ge.f32.partialorder %v855_v29, %v1235_v25  ;;  %vm859_vm7 = vcmp.ge.f32.partialorder %v855_v29, %v1237_v26 }
  0xb9   :  { %v848_v47 = vadd.f32 %v844_v46, %v820_v38  ;;  %v849_v48 = vadd.f32 %v845_v30, %v821_v39  ;;  %v850_v49 = vadd.f32 %v846_v43, %v822_v40  ;;  %v851_v50 = vadd.f32 %v847_v10, %v823_v41 }
  0xba   :  { %v1126_v51 = vsel %vm856_vm4, 1.0, %v1197_v35  ;;  %v1127_v52 = vsel %vm857_vm5, 1.0, %v1197_v35  ;;  %v1128_v53 = vsel %vm858_vm6, 1.0, %v1197_v35  ;;  %v1129_v54 = vsel %vm859_vm7, 1.0, %v1197_v35 }
  0xbb   :  { %v868_v55 = vadd.f32 %v1126_v51, %v840_v32  ;;  %v869_v56 = vadd.f32 %v1127_v52, %v841_v42  ;;  %v870_v59 = vadd.f32 %v1128_v53, %v842_v45  ;;  %v871_v31 = vadd.f32 %v1129_v54, %v843_v33 }
  0xbc   :  { %v872_v57 = vmul.f32 %v1126_v51, %v855_v29  ;;  %v873_v34 = vmul.f32 %v1127_v52, %v855_v29  ;;  %v874_v62 = vmul.f32 %v1128_v53, %v855_v29  ;;  %v875_v60 = vmul.f32 %v1129_v54, %v855_v29 }
  0xbd   :  { %vm884_vm8 = vcmp.ge.f32.partialorder %v883_v36, %v1231_v23  ;;  %vm885_vm9 = vcmp.ge.f32.partialorder %v883_v36, %v1233_v24  ;;  %vm886_vm10 = vcmp.ge.f32.partialorder %v883_v36, %v1235_v25  ;;  %vm887_vm11 = vcmp.ge.f32.partialorder %v883_v36, %v1237_v26 }
  0xbe   :  { %v876_v44 = vadd.f32 %v872_v57, %v848_v47  ;;  %v877_v63 = vadd.f32 %v873_v34, %v849_v48  ;;  %v878_v0 = vadd.f32 %v874_v62, %v850_v49  ;;  %v879_v1 = vadd.f32 %v875_v60, %v851_v50 }
  0xbf   :  { %v1130_v2 = vsel %vm884_vm8, 1.0, %v1197_v35  ;;  %v1131_v3 = vsel %vm885_vm9, 1.0, %v1197_v35  ;;  %v1132_v4 = vsel %vm886_vm10, 1.0, %v1197_v35  ;;  %v1133_v5 = vsel %vm887_vm11, 1.0, %v1197_v35 }
  0xc0   :  { %v896_v6 = vadd.f32 %v1130_v2, %v868_v55  ;;  %v897_v7 = vadd.f32 %v1131_v3, %v869_v56  ;;  %v898_v8 = vadd.f32 %v1132_v4, %v870_v59  ;;  %v899_v11 = vadd.f32 %v1133_v5, %v871_v31 }
  0xc1   :  { %v900_v12 = vmul.f32 %v1130_v2, %v883_v36  ;;  %v901_v13 = vmul.f32 %v1131_v3, %v883_v36  ;;  %v902_v9 = vmul.f32 %v1132_v4, %v883_v36  ;;  %v903_v58 = vmul.f32 %v1133_v5, %v883_v36 }
  0xc2   :  { %vm912_vm12 = vcmp.ge.f32.partialorder %v1627_v37, %v1231_v23  ;;  %vm913_vm13 = vcmp.ge.f32.partialorder %v1627_v37, %v1233_v24  ;;  %vm914_vm14 = vcmp.ge.f32.partialorder %v1627_v37, %v1235_v25  ;;  %vm915_vm15 = vcmp.ge.f32.partialorder %v1627_v37, %v1237_v26 }
  0xc3   :  { %v904_v15 = vadd.f32 %v900_v12, %v876_v44  ;;  %v905_v14 = vadd.f32 %v901_v13, %v877_v63  ;;  %v906_v16 = vadd.f32 %v902_v9, %v878_v0  ;;  %v907_v17 = vadd.f32 %v903_v58, %v879_v1 }
  0xc4   :  { %v1134_v18 = vsel %vm912_vm12, 1.0, %v1197_v35  ;;  %v1135_v61 = vsel %vm913_vm13, 1.0, %v1197_v35  ;;  %v1136_v27 = vsel %vm914_vm14, 1.0, %v1197_v35  ;;  %v1137_v28 = vsel %vm915_vm15, 1.0, %v1197_v35 }
  0xc5   :  { %v924_v29 = vadd.f32 %v1134_v18, %v896_v6  ;;  %v925_v36 = vadd.f32 %v1135_v61, %v897_v7  ;;  %v926_v38 = vadd.f32 %v1136_v27, %v898_v8  ;;  %v927_v39 = vadd.f32 %v1137_v28, %v899_v11 }
  0xc6   :  { %v928_v40 = vmul.f32 %v1134_v18, %v1627_v37  ;;  %v929_v41 = vmul.f32 %v1135_v61, %v1627_v37  ;;  %v930_v19 = vmul.f32 %v1136_v27, %v1627_v37  ;;  %v931_v20 = vmul.f32 %v1137_v28, %v1627_v37 }
  0xc7   :  { %v936_v21 = vmul.f32 %v924_v29, %v1231_v23  ;;  %v937_v22 = vmul.f32 %v925_v36, %v1233_v24  ;;  %v938_v32 = vmul.f32 %v926_v38, %v1235_v25  ;;  %v939_v42 = vmul.f32 %v927_v39, %v1237_v26 }
  0xc8   :  { %v932_v45 = vadd.f32 %v928_v40, %v904_v15  ;;  %v933_v33 = vadd.f32 %v929_v41, %v905_v14  ;;  %v934_v46 = vadd.f32 %v930_v19, %v906_v16  ;;  %v935_v30 = vadd.f32 %v931_v20, %v907_v17 }
  0xc9   :  { %v940_v43 = vadd.f32 1.0, %v936_v21  ;;  %v941_v10 = vadd.f32 1.0, %v937_v22  ;;  %v942_v47 = vadd.f32 1.0, %v938_v32  ;;  %v943_v48 = vadd.f32 1.0, %v939_v42 }
  0xcb   :  { %vm944_vm0 = vcmp.gt.f32.partialorder %v940_v43, %v932_v45  ;;  %vm945_vm1 = vcmp.gt.f32.partialorder %v941_v10, %v933_v33  ;;  %vm946_vm2 = vcmp.gt.f32.partialorder %v942_v47, %v934_v46  ;;  %vm947_vm3 = vcmp.gt.f32.partialorder %v943_v48, %v935_v30 }
  0xcc   :  { %v1138_v37 = vsel %vm944_vm0, 1.0, %v1197_v35  ;;  %v1139_v49 = vsel %vm945_vm1, 1.0, %v1197_v35  ;;  %v1140_v50 = vsel %vm946_vm2, 1.0, %v1197_v35  ;;  %v965_v52 = vsel %vm944_vm0, %v1231_v23, 0.0 }
  0xcd   :  { %v956_v51 = vadd.f32 %v1139_v49, %v1138_v37  ;;  %v966_v53 = vsel %vm945_vm1, %v1233_v24, 0.0  ;;  %v967_v54 = vsel %vm946_vm2, %v1235_v25, 0.0  ;;  %v1141_v55 = vsel %vm947_vm3, 1.0, %v1197_v35 }
  0xce   :  { %v969_v56 = vadd.f32 %v966_v53, %v965_v52  ;;  %v968_v31 = vsel %vm947_vm3, %v1237_v26, 0.0 }
  0xcf   :  { %v957_v59 = vadd.f32 %v1140_v50, %v956_v51 }
  0xd0   :  { %v970_v57 = vadd.f32 %v969_v56, %v967_v54 }
  0xd1   :  { %v958_v34 = vadd.f32 %v1141_v55, %v957_v59 }
  0xd2   :  { %v971_v62 = vadd.f32 %v970_v57, %v968_v31 }
  0xd3   :  { %v959_v60 = vrot.slane %v958_v34, 4 }
  0xd4   :  { %v972_v44 = vrot.slane %v971_v62, 4 }
  0xd5   :  { %v960_v63 = vadd.f32 %v959_v60, %v958_v34 }
  0xd6   :  { %v973_v0 = vadd.f32 %v972_v44, %v971_v62 }
  0xd7   :  { %v961_v1 = vrot.slane %v960_v63, 2 }
  0xd8   :  { %v974_v3 = vrot.slane %v973_v0, 2 }
  0xd9   :  { %v962_v2 = vadd.f32 %v961_v1, %v960_v63 }
  0xda   :  { %v975_v6 = vadd.f32 %v974_v3, %v973_v0 }
  0xdb   :  { %v963_v4 = vrot.slane %v962_v2, 1 }
  0xdc   :  { %v976_v7 = vrot.slane %v975_v6, 1 }
  0xdd   :  { %v964_v5 = vadd.f32 %v963_v4, %v962_v2 }
  0xde   :  { %v977_v35 = vadd.f32 %v976_v7, %v975_v6 }
  0xdf   :  { %1148 = vrcp.f32 %v964_v5 }
  0xe0   :  { %v1142_v8 = vadd.f32 -1.0, %v977_v35 }
  0xec   :  { %v1149_v11 = vpop.eup %1148 }
  0xed   :  { %v980_v12 = vmul.f32 %v1149_v11, %v1142_v8 }
  0xef   :  { %v981_v13 = vsub.f32 %v1231_v23, %v980_v12  ;;  %v982_v9 = vsub.f32 %v1233_v24, %v980_v12  ;;  %v983_v58 = vsub.f32 %v1235_v25, %v980_v12  ;;  %v984_v15 = vsub.f32 %v1237_v26, %v980_v12 }
  0xf1   :  { %v985_v14 = vmax.f32 %v981_v13, 0.0  ;;  %v986_v16 = vmax.f32 %v982_v9, 0.0  ;;  %v987_v17 = vmax.f32 %v983_v58, 0.0  ;;  %v988_v18 = vmax.f32 %v984_v15, 0.0 }
  0xf3   :  { %989 = vst [vmem:[#allocation5] sm:$0xff] %v985_v14  ;;  %990 = vst [vmem:[#allocation5 + $0x8] sm:$0xff] %v986_v16 }
  0xf4   :  { %991 = vst [vmem:[#allocation5 + $0x10] sm:$0xff] %v987_v17  ;;  %992 = vst [vmem:[#allocation5 + $0x18] sm:$0xff] %v988_v18 }
  0xf5   :  { %1181 = shalt.err (!%p1178_p9)
}
  0xf6   :  { %1004 = dma.vmem_to_hbm [thread:$0]  %s999_s13, 512, %s1692_s1, [#allocation4], %s1195_s9, %s1195_s9, %s1196_s10  }
  0xf7   :  { %1192 = dma.done.wait [#allocation4], 512  }
  0xf8   :  { %1193 = vsyncadd [#allocation4], 4294966784 }
  0xf9   :  { %1008 = vsyncpa [#allocation3], 1 }
  0xfa   :  { %1009 = vsyncpa [#allocation4], 1 }

</bundles_post_ra>
